<compile_context>
chip_gen: v6e
topology: v6e:2x2x1
jax: 0.10.0
libtpu: 0.0.40
codegen_flags: <defaults>
</compile_context>

<pallas_src>
import jax
import jax.numpy as jnp
from jax.experimental import pallas as pl
from jax.experimental.pallas import tpu as pltpu

# ----------------------- small synthetic BERT config -----------------------
VOCAB = 128          # bert.config.vocab_size
HIDDEN = 32          # bert.config.hidden_size
N_HEADS = 4
HEAD_DIM = HIDDEN // N_HEADS
INTERMEDIATE = 64
N_LAYERS = 2
MAX_POS = 64
PAD_ID = 0           # tokenizer.pad_token_id
LN_EPS = 1e-12
NEG_INF = -1e9       # additive value for masked attention positions
TM = 8               # token-row tile for the 2D kernels (grid >= 2 -> both v7x TCs)


# ------------------------------ in-kernel helpers ---------------------------
def _ln(x, g, b):
    """Row-wise LayerNorm over the hidden axis; f32 statistics."""
    mean = jnp.mean(x, axis=-1, keepdims=True)
    var = jnp.mean(jnp.square(x - mean), axis=-1, keepdims=True)
    inv = jax.lax.rsqrt(var + LN_EPS)
    return (x - mean) * inv * g + b


def _gelu(x):
    # TODO(synk): HF BERT uses exact erf-GELU; tanh approximation used here
    # (numerically ~1e-3 close, and tanh maps to the EUP cleanly).
    c = 0.7978845608028654  # sqrt(2/pi)
    return 0.5 * x * (1.0 + jnp.tanh(c * (x + 0.044715 * x * x * x)))


# ------------------------------- kernels -----------------------------------
def _layernorm_kernel(x_ref, g_ref, b_ref, o_ref):
    o_ref[...] = _ln(x_ref[...].astype(jnp.float32), g_ref[...], b_ref[...])


def _encoder_layer_kernel(pad_ref, h_ref,
                          wqkv_ref, bqkv_ref, wo_ref, bo_ref,
                          ln1_g_ref, ln1_b_ref,
                          wi_ref, bi_ref, w2_ref, b2_ref,
                          ln2_g_ref, ln2_b_ref,
                          o_ref):
    """One fused BERT encoder layer for a single batch element (grid axis = batch)."""
    h = h_ref[0].astype(jnp.float32)                          # (S, H)
    S = h.shape[0]

    # ---- additive attention bias built in-kernel (no (S,S) HBM traffic) ----
    pad = pad_ref[0]                                          # (1, S) f32 pad flags
    row = jax.lax.broadcasted_iota(jnp.int32, (S, S), 0)
    col = jax.lax.broadcasted_iota(jnp.int32, (S, S), 1)
    keep = (col <= row) & (jnp.broadcast_to(pad, (S, S)) > 0.5)
    bias = jnp.where(keep, 0.0, NEG_INF)                      # (S, S) f32

    # ---- fused Q|K|V projection: one bf16 MXU pass, f32 accumulation ----
    qkv = jnp.dot(h.astype(jnp.bfloat16), wqkv_ref[...],
                  preferred_element_type=jnp.float32) + bqkv_ref[...]   # (S, 3H)

    # ---- per-head attention; output projection accumulated head-by-head ----
    #   ctx @ Wo == sum_h ctx_h @ Wo[h*Dh:(h+1)*Dh, :]   (sublane-aligned W slices)
    scale = 1.0 / jnp.sqrt(jnp.float32(HEAD_DIM))
    attn_out = jnp.broadcast_to(bo_ref[...], (S, HIDDEN)).astype(jnp.float32)
    for hd in range(N_HEADS):                                 # static head loop
        q = qkv[:, hd * HEAD_DIM:(hd + 1) * HEAD_DIM]
        k = qkv[:, HIDDEN + hd * HEAD_DIM:HIDDEN + (hd + 1) * HEAD_DIM]
        v = qkv[:, 2 * HIDDEN + hd * HEAD_DIM:2 * HIDDEN + (hd + 1) * HEAD_DIM]
        s = jax.lax.dot_general(q, k, (((1,), (1,)), ((), ())),
                                preferred_element_type=jnp.float32) * scale + bias
        m = jnp.max(s, axis=-1, keepdims=True)
        p = jnp.exp(s - m)                                    # f32 softmax numerics
        p = p * pl.reciprocal(jnp.sum(p, axis=-1, keepdims=True), approx=True)
        ctx_h = jnp.dot(p, v, preferred_element_type=jnp.float32)        # (S, Dh)
        attn_out = attn_out + jnp.dot(
            ctx_h.astype(jnp.bfloat16),
            wo_ref[hd * HEAD_DIM:(hd + 1) * HEAD_DIM, :],
            preferred_element_type=jnp.float32)

    # ---- fused residual + LayerNorm ----
    h = _ln(attn_out + h, ln1_g_ref[...], ln1_b_ref[...])

    # ---- FFN (GELU) + fused residual + LayerNorm ----
    inter = _gelu(jnp.dot(h.astype(jnp.bfloat16), wi_ref[...],
                          preferred_element_type=jnp.float32) + bi_ref[...])
    ffn_out = jnp.dot(inter.astype(jnp.bfloat16), w2_ref[...],
                      preferred_element_type=jnp.float32) + b2_ref[...]
    h = _ln(ffn_out + h, ln2_g_ref[...], ln2_b_ref[...])

    o_ref[0] = h


def _cls_softmax_kernel(x_ref, w_ref, b_ref, o_ref):
    """Fused vocab projection + softmax: (TM, VOCAB) logits never hit HBM raw."""
    logits = jnp.dot(x_ref[...].astype(jnp.bfloat16), w_ref[...],
                     preferred_element_type=jnp.float32) + b_ref[...]
    m = jnp.max(logits, axis=-1, keepdims=True)
    e = jnp.exp(logits - m)
    o_ref[...] = e / jnp.sum(e, axis=-1, keepdims=True)   # exact normalize


# ------------------------------ pallas wrappers -----------------------------
def layernorm(x2d, g, b):
    M, H = x2d.shape
    return pl.pallas_call(
        _layernorm_kernel,
        out_shape=jax.ShapeDtypeStruct((M, H), jnp.float32),
        grid=(pl.cdiv(M, TM),),
        in_specs=[pl.BlockSpec((TM, H), lambda i: (i, 0)),
                  pl.BlockSpec((1, H), lambda i: (0, 0)),
                  pl.BlockSpec((1, H), lambda i: (0, 0))],
        out_specs=pl.BlockSpec((TM, H), lambda i: (i, 0)),
        compiler_params=pltpu.CompilerParams(dimension_semantics=("parallel",)),
    )(x2d, g.reshape(1, H), b.reshape(1, H))


def _full_spec(arr):
    nd = arr.ndim
    return pl.BlockSpec(arr.shape, lambda b, _nd=nd: (0,) * _nd)


def encoder_layer(h, pad_mask, lyr):
    """h: (B, S, H) f32; pad_mask: (B, 1, S) f32; one fused pallas_call per layer."""
    B, S, H = h.shape
    return pl.pallas_call(
        _encoder_layer_kernel,
        out_shape=jax.ShapeDtypeStruct((B, S, H), jnp.float32),
        grid=(B,),
        in_specs=[pl.BlockSpec((1, 1, S), lambda b: (b, 0, 0)),   # pad flags
                  pl.BlockSpec((1, S, H), lambda b: (b, 0, 0)),   # activations
                  _full_spec(lyr["wqkv"]), _full_spec(lyr["bqkv"]),
                  _full_spec(lyr["wo"]), _full_spec(lyr["bo"]),
                  _full_spec(lyr["ln1_g"]), _full_spec(lyr["ln1_b"]),
                  _full_spec(lyr["w_inter"]), _full_spec(lyr["b_inter"]),
                  _full_spec(lyr["w_out"]), _full_spec(lyr["b_out"]),
                  _full_spec(lyr["ln2_g"]), _full_spec(lyr["ln2_b"])],
        out_specs=pl.BlockSpec((1, S, H), lambda b: (b, 0, 0)),
        compiler_params=pltpu.CompilerParams(dimension_semantics=("parallel",)),
    )(pad_mask, h,
      lyr["wqkv"], lyr["bqkv"], lyr["wo"], lyr["bo"],
      lyr["ln1_g"], lyr["ln1_b"],
      lyr["w_inter"], lyr["b_inter"], lyr["w_out"], lyr["b_out"],
      lyr["ln2_g"], lyr["ln2_b"])


def classify_softmax(h2d, w, b):
    M, H = h2d.shape
    V = w.shape[1]
    return pl.pallas_call(
        _cls_softmax_kernel,
        out_shape=jax.ShapeDtypeStruct((M, V), jnp.float32),
        grid=(pl.cdiv(M, TM),),
        in_specs=[pl.BlockSpec((TM, H), lambda i: (i, 0)),
                  pl.BlockSpec((H, V), lambda i: (0, 0)),
                  pl.BlockSpec((1, V), lambda i: (0, 0))],
        out_specs=pl.BlockSpec((TM, V), lambda i: (i, 0)),
        compiler_params=pltpu.CompilerParams(dimension_semantics=("parallel",)),
    )(h2d, w, b)


# ------------------------------ parameters ----------------------------------
def init_params(key):
    keys = iter(jax.random.split(key, 64))

    def normal(shape):
        return 0.02 * jax.random.normal(next(keys), shape, jnp.float32)

    params = {
        "word_emb": normal((VOCAB, HIDDEN)),
        "pos_emb": normal((MAX_POS, HIDDEN)),
        "type_emb": normal((2, HIDDEN)),
        "emb_ln_g": jnp.ones((HIDDEN,), jnp.float32),
        "emb_ln_b": jnp.zeros((HIDDEN,), jnp.float32),
        "cls_w": normal((HIDDEN, VOCAB)).astype(jnp.bfloat16),   # (in, out) == torch Linear.T
        "cls_b": jnp.zeros((1, VOCAB), jnp.float32),
        "layers": [],
    }
    for _ in range(N_LAYERS):
        wq, wk, wv = (normal((HIDDEN, HIDDEN)) for _ in range(3))
        params["layers"].append(dict(
            wqkv=jnp.concatenate([wq, wk, wv], axis=1).astype(jnp.bfloat16),  # (H, 3H)
            bqkv=jnp.zeros((1, 3 * HIDDEN), jnp.float32),
            wo=normal((HIDDEN, HIDDEN)).astype(jnp.bfloat16),
            bo=jnp.zeros((1, HIDDEN), jnp.float32),
            ln1_g=jnp.ones((1, HIDDEN), jnp.float32),
            ln1_b=jnp.zeros((1, HIDDEN), jnp.float32),
            w_inter=normal((HIDDEN, INTERMEDIATE)).astype(jnp.bfloat16),
            b_inter=jnp.zeros((1, INTERMEDIATE), jnp.float32),
            w_out=normal((INTERMEDIATE, HIDDEN)).astype(jnp.bfloat16),
            b_out=jnp.zeros((1, HIDDEN), jnp.float32),
            ln2_g=jnp.ones((1, HIDDEN), jnp.float32),
            ln2_b=jnp.zeros((1, HIDDEN), jnp.float32),
        ))
    return params


# ------------------------------ forward pass ---------------------------------
def language_model_forward(params, x):
    """x: int32 token ids (B, S).  Returns softmax probs (B, S, VOCAB)."""
    B, S = x.shape

    # pad flags; causal x pad mask is rebuilt inside the attention kernel.
    pad_mask = (x != PAD_ID).astype(jnp.float32).reshape(B, 1, S)

    # embeddings (gathers are plain-JAX glue)
    h = (params["word_emb"][x]
         + params["pos_emb"][:S][None, :, :]
         + params["type_emb"][0][None, None, :])                  # (B, S, H)
    h = layernorm(h.reshape(B * S, HIDDEN),
                  params["emb_ln_g"], params["emb_ln_b"]).reshape(B, S, HIDDEN)

    for lyr in params["layers"]:
        h = encoder_layer(h, pad_mask, lyr)                       # fully fused layer

    # TODO(synk): CrossEntropyLoss (y is not None) training path not implemented;
    # only the inference path (return softmax(logits, dim=-1)) is reproduced.
    probs = classify_softmax(h.reshape(B * S, HIDDEN),
                             params["cls_w"], params["cls_b"])    # (B*S, VOCAB)
    return probs.reshape(B, S, VOCAB)


# --------------------------------- main --------------------------------------
if __name__ == "__main__":
    key = jax.random.PRNGKey(0)
    pkey, xkey = jax.random.split(key)

    params = init_params(pkey)

    B, S = 2, 8
    x = jax.random.randint(xkey, (B, S), minval=1, maxval=VOCAB, dtype=jnp.int32)
    # add a couple of pad tokens to exercise the padding mask
    x = x.at[1, -2:].set(PAD_ID)

    fwd = jax.jit(language_model_forward)
    probs = jax.block_until_ready(fwd(params, x))

    assert probs.shape == (B, S, VOCAB)
    row_sums = jnp.sum(probs, axis=-1)
    assert bool(jnp.all(jnp.abs(row_sums - 1.0) < 1e-4))
    print("KERNEL_OK")
</pallas_src>

<mosaic_0001>
module attributes {stable_mosaic.version = 11 : i64} {
  func.func @_cls_softmax_kernel(%arg0: i32, %arg1: memref<8x32xf32, #tpu.memory_space<vmem>>, %arg2: memref<32x128xbf16, #tpu.memory_space<vmem>>, %arg3: memref<1x128xf32, #tpu.memory_space<vmem>>, %arg4: memref<8x128xf32, #tpu.memory_space<vmem>>) attributes {dimension_semantics = [#tpu.dimension_semantics<parallel>], iteration_bounds = array<i64: 2>, scalar_prefetch = 0 : i64, scratch_operands = 0 : i64, tpu.core_type = #tpu.core_type<tc>, window_params = [{transform_indices = @transform_0, window_bounds = array<i64: 8, 32>}, {pipeline_mode = #tpu.pipeline_mode<synchronous>, transform_indices = @transform_1, window_bounds = array<i64: 32, 128>}, {pipeline_mode = #tpu.pipeline_mode<synchronous>, transform_indices = @transform_2, window_bounds = array<i64: 1, 128>}, {transform_indices = @transform_3, window_bounds = array<i64: 8, 128>}]} {
    %c0 = arith.constant 0 : index
    %c0_0 = arith.constant 0 : index
    %0 = vector.load %arg1[%c0, %c0_0] : memref<8x32xf32, #tpu.memory_space<vmem>>, vector<8x32xf32>
    %1 = arith.truncf %0 : vector<8x32xf32> to vector<8x32xbf16>
    %c0_1 = arith.constant 0 : index
    %c0_2 = arith.constant 0 : index
    %2 = vector.load %arg2[%c0_1, %c0_2] : memref<32x128xbf16, #tpu.memory_space<vmem>>, vector<32x128xbf16>
    %cst = arith.constant dense<0.000000e+00> : vector<8x128xf32>
    %3 = tpu.matmul %1, %2, %cst {dimension_numbers = #tpu.dot_dimension_numbers<[1], [0], [0], [1], [0, 0, 1, 1], [], []>} : vector<8x32xbf16>, vector<32x128xbf16>, vector<8x128xf32> -> vector<8x128xf32>
    %c0_3 = arith.constant 0 : index
    %c0_4 = arith.constant 0 : index
    %4 = vector.load %arg3[%c0_3, %c0_4] : memref<1x128xf32, #tpu.memory_space<vmem>>, vector<1x128xf32>
    %5 = vector.broadcast %4 : vector<1x128xf32> to vector<8x128xf32>
    %6 = arith.addf %3, %5 : vector<8x128xf32>
    %cst_5 = arith.constant dense<0xFF800000> : vector<8xf32>
    %7 = vector.multi_reduction <maximumf>, %6, %cst_5 [1] : vector<8x128xf32> to vector<8xf32>
    %8 = vector.shape_cast %7 : vector<8xf32> to vector<8x1xf32>
    %9 = vector.broadcast %8 : vector<8x1xf32> to vector<8x128xf32>
    %10 = arith.subf %6, %9 : vector<8x128xf32>
    %11 = math.exp %10 : vector<8x128xf32>
    %cst_6 = arith.constant dense<0.000000e+00> : vector<8xf32>
    %12 = vector.multi_reduction <add>, %11, %cst_6 [1] : vector<8x128xf32> to vector<8xf32>
    %13 = vector.shape_cast %12 : vector<8xf32> to vector<8x1xf32>
    %14 = vector.broadcast %13 : vector<8x1xf32> to vector<8x128xf32>
    %15 = arith.divf %11, %14 : vector<8x128xf32>
    %c0_7 = arith.constant 0 : index
    %c0_8 = arith.constant 0 : index
    %16 = vector.load %arg4[%c0_7, %c0_8] : memref<8x128xf32, #tpu.memory_space<vmem>>, vector<8x128xf32>
    tpu.vector_store %arg4[%c0_7, %c0_8], %15 {strides = array<i32>} : memref<8x128xf32, #tpu.memory_space<vmem>>, vector<8x128xf32>,
    return
  }
  func.func @transform_0(%arg0: i32) -> (i32, i32) {
    %c0_i32 = arith.constant 0 : i32
    %c0_i32_0 = arith.constant 0 : i32
    return %arg0, %c0_i32 : i32, i32
  }
  func.func @transform_1(%arg0: i32) -> (i32, i32) {
    %c0_i32 = arith.constant 0 : i32
    %c0_i32_0 = arith.constant 0 : i32
    %c0_i32_1 = arith.constant 0 : i32
    return %c0_i32, %c0_i32_0 : i32, i32
  }
  func.func @transform_2(%arg0: i32) -> (i32, i32) {
    %c0_i32 = arith.constant 0 : i32
    %c0_i32_0 = arith.constant 0 : i32
    %c0_i32_1 = arith.constant 0 : i32
    return %c0_i32, %c0_i32_0 : i32, i32
  }
  func.func @transform_3(%arg0: i32) -> (i32, i32) {
    %c0_i32 = arith.constant 0 : i32
    %c0_i32_0 = arith.constant 0 : i32
    return %arg0, %c0_i32 : i32, i32
  }
}

module attributes {stable_mosaic.version = 11 : i64} {
  func.func @_layernorm_kernel(%arg0: i32, %arg1: memref<8x32xf32, #tpu.memory_space<vmem>>, %arg2: memref<1x32xf32, #tpu.memory_space<vmem>>, %arg3: memref<1x32xf32, #tpu.memory_space<vmem>>, %arg4: memref<8x32xf32, #tpu.memory_space<vmem>>) attributes {dimension_semantics = [#tpu.dimension_semantics<parallel>], iteration_bounds = array<i64: 2>, scalar_prefetch = 0 : i64, scratch_operands = 0 : i64, tpu.core_type = #tpu.core_type<tc>, window_params = [{transform_indices = @transform_0, window_bounds = array<i64: 8, 32>}, {pipeline_mode = #tpu.pipeline_mode<synchronous>, transform_indices = @transform_1, window_bounds = array<i64: 1, 32>}, {pipeline_mode = #tpu.pipeline_mode<synchronous>, transform_indices = @transform_2, window_bounds = array<i64: 1, 32>}, {transform_indices = @transform_3, window_bounds = array<i64: 8, 32>}]} {
    %c0 = arith.constant 0 : index
    %c0_0 = arith.constant 0 : index
    %0 = vector.load %arg1[%c0, %c0_0] : memref<8x32xf32, #tpu.memory_space<vmem>>, vector<8x32xf32>
    %c0_1 = arith.constant 0 : index
    %c0_2 = arith.constant 0 : index
    %1 = vector.load %arg2[%c0_1, %c0_2] : memref<1x32xf32, #tpu.memory_space<vmem>>, vector<1x32xf32>
    %c0_3 = arith.constant 0 : index
    %c0_4 = arith.constant 0 : index
    %2 = vector.load %arg3[%c0_3, %c0_4] : memref<1x32xf32, #tpu.memory_space<vmem>>, vector<1x32xf32>
    %cst = arith.constant dense<0.000000e+00> : vector<8xf32>
    %3 = vector.multi_reduction <add>, %0, %cst [1] : vector<8x32xf32> to vector<8xf32>
    %4 = vector.shape_cast %3 : vector<8xf32> to vector<8x1xf32>
    %cst_5 = arith.constant 3.200000e+01 : f32
    %5 = vector.broadcast %cst_5 : f32 to vector<8x1xf32>
    %6 = arith.divf %4, %5 : vector<8x1xf32>
    %7 = vector.broadcast %6 : vector<8x1xf32> to vector<8x32xf32>
    %8 = arith.subf %0, %7 : vector<8x32xf32>
    %9 = arith.mulf %8, %8 : vector<8x32xf32>
    %cst_6 = arith.constant dense<0.000000e+00> : vector<8xf32>
    %10 = vector.multi_reduction <add>, %9, %cst_6 [1] : vector<8x32xf32> to vector<8xf32>
    %11 = vector.shape_cast %10 : vector<8xf32> to vector<8x1xf32>
    %cst_7 = arith.constant 3.200000e+01 : f32
    %12 = vector.broadcast %cst_7 : f32 to vector<8x1xf32>
    %13 = arith.divf %11, %12 : vector<8x1xf32>
    %cst_8 = arith.constant 9.99999996E-13 : f32
    %14 = vector.broadcast %cst_8 : f32 to vector<8x1xf32>
    %15 = arith.addf %13, %14 : vector<8x1xf32>
    %16 = math.rsqrt %15 : vector<8x1xf32>
    %17 = vector.broadcast %6 : vector<8x1xf32> to vector<8x32xf32>
    %18 = arith.subf %0, %17 : vector<8x32xf32>
    %19 = vector.broadcast %16 : vector<8x1xf32> to vector<8x32xf32>
    %20 = arith.mulf %18, %19 : vector<8x32xf32>
    %21 = vector.broadcast %1 : vector<1x32xf32> to vector<8x32xf32>
    %22 = arith.mulf %20, %21 : vector<8x32xf32>
    %23 = vector.broadcast %2 : vector<1x32xf32> to vector<8x32xf32>
    %24 = arith.addf %22, %23 : vector<8x32xf32>
    %c0_9 = arith.constant 0 : index
    %c0_10 = arith.constant 0 : index
    %25 = vector.load %arg4[%c0_9, %c0_10] : memref<8x32xf32, #tpu.memory_space<vmem>>, vector<8x32xf32>
    tpu.vector_store %arg4[%c0_9, %c0_10], %24 {strides = array<i32>} : memref<8x32xf32, #tpu.memory_space<vmem>>, vector<8x32xf32>,
    return
  }
  func.func @transform_0(%arg0: i32) -> (i32, i32) {
    %c0_i32 = arith.constant 0 : i32
    %c0_i32_0 = arith.constant 0 : i32
    return %arg0, %c0_i32 : i32, i32
  }
  func.func @transform_1(%arg0: i32) -> (i32, i32) {
    %c0_i32 = arith.constant 0 : i32
    %c0_i32_0 = arith.constant 0 : i32
    %c0_i32_1 = arith.constant 0 : i32
    return %c0_i32, %c0_i32_0 : i32, i32
  }
  func.func @transform_2(%arg0: i32) -> (i32, i32) {
    %c0_i32 = arith.constant 0 : i32
    %c0_i32_0 = arith.constant 0 : i32
    %c0_i32_1 = arith.constant 0 : i32
    return %c0_i32, %c0_i32_0 : i32, i32
  }
  func.func @transform_3(%arg0: i32) -> (i32, i32) {
    %c0_i32 = arith.constant 0 : i32
    %c0_i32_0 = arith.constant 0 : i32
    return %arg0, %c0_i32 : i32, i32
  }
}

module attributes {stable_mosaic.version = 11 : i64} {
  func.func @_encoder_layer_kernel(%arg0: i32, %arg1: memref<1x1x8xf32, #tpu.memory_space<vmem>>, %arg2: memref<1x8x32xf32, #tpu.memory_space<vmem>>, %arg3: memref<32x96xbf16, #tpu.memory_space<vmem>>, %arg4: memref<1x96xf32, #tpu.memory_space<vmem>>, %arg5: memref<32x32xbf16, #tpu.memory_space<vmem>>, %arg6: memref<1x32xf32, #tpu.memory_space<vmem>>, %arg7: memref<1x32xf32, #tpu.memory_space<vmem>>, %arg8: memref<1x32xf32, #tpu.memory_space<vmem>>, %arg9: memref<32x64xbf16, #tpu.memory_space<vmem>>, %arg10: memref<1x64xf32, #tpu.memory_space<vmem>>, %arg11: memref<64x32xbf16, #tpu.memory_space<vmem>>, %arg12: memref<1x32xf32, #tpu.memory_space<vmem>>, %arg13: memref<1x32xf32, #tpu.memory_space<vmem>>, %arg14: memref<1x32xf32, #tpu.memory_space<vmem>>, %arg15: memref<1x8x32xf32, #tpu.memory_space<vmem>>) attributes {dimension_semantics = [#tpu.dimension_semantics<parallel>], iteration_bounds = array<i64: 2>, scalar_prefetch = 0 : i64, scratch_operands = 0 : i64, tpu.core_type = #tpu.core_type<tc>, window_params = [{transform_indices = @transform_0, window_bounds = array<i64: 1, 1, 8>}, {transform_indices = @transform_1, window_bounds = array<i64: 1, 8, 32>}, {pipeline_mode = #tpu.pipeline_mode<synchronous>, transform_indices = @transform_2, window_bounds = array<i64: 32, 96>}, {pipeline_mode = #tpu.pipeline_mode<synchronous>, transform_indices = @transform_3, window_bounds = array<i64: 1, 96>}, {pipeline_mode = #tpu.pipeline_mode<synchronous>, transform_indices = @transform_4, window_bounds = array<i64: 32, 32>}, {pipeline_mode = #tpu.pipeline_mode<synchronous>, transform_indices = @transform_5, window_bounds = array<i64: 1, 32>}, {pipeline_mode = #tpu.pipeline_mode<synchronous>, transform_indices = @transform_6, window_bounds = array<i64: 1, 32>}, {pipeline_mode = #tpu.pipeline_mode<synchronous>, transform_indices = @transform_7, window_bounds = array<i64: 1, 32>}, {pipeline_mode = #tpu.pipeline_mode<synchronous>, transform_indices = @transform_8, window_bounds = array<i64: 32, 64>}, {pipeline_mode = #tpu.pipeline_mode<synchronous>, transform_indices = @transform_9, window_bounds = array<i64: 1, 64>}, {pipeline_mode = #tpu.pipeline_mode<synchronous>, transform_indices = @transform_10, window_bounds = array<i64: 64, 32>}, {pipeline_mode = #tpu.pipeline_mode<synchronous>, transform_indices = @transform_11, window_bounds = array<i64: 1, 32>}, {pipeline_mode = #tpu.pipeline_mode<synchronous>, transform_indices = @transform_12, window_bounds = array<i64: 1, 32>}, {pipeline_mode = #tpu.pipeline_mode<synchronous>, transform_indices = @transform_13, window_bounds = array<i64: 1, 32>}, {transform_indices = @transform_14, window_bounds = array<i64: 1, 8, 32>}]} {
    %c0 = arith.constant 0 : index
    %c0_0 = arith.constant 0 : index
    %c0_1 = arith.constant 0 : index
    %0 = vector.load %arg2[%c0, %c0_0, %c0_1] : memref<1x8x32xf32, #tpu.memory_space<vmem>>, vector<1x8x32xf32>
    %1 = vector.shape_cast %0 : vector<1x8x32xf32> to vector<8x32xf32>
    %c0_2 = arith.constant 0 : index
    %c0_3 = arith.constant 0 : index
    %c0_4 = arith.constant 0 : index
    %2 = vector.load %arg1[%c0_2, %c0_3, %c0_4] : memref<1x1x8xf32, #tpu.memory_space<vmem>>, vector<1x1x8xf32>
    %3 = vector.shape_cast %2 : vector<1x1x8xf32> to vector<1x8xf32>
    %4 = tpu.iota {dimensions = array<i32: 0>} : vector<8x8xi32>
    %5 = tpu.iota {dimensions = array<i32: 1>} : vector<8x8xi32>
    %6 = arith.cmpi sle, %5, %4 : vector<8x8xi32>
    %7 = vector.shape_cast %3 : vector<1x8xf32> to vector<1x8xf32>
    %8 = vector.broadcast %7 : vector<1x8xf32> to vector<8x8xf32>
    %cst = arith.constant 5.000000e-01 : f32
    %9 = vector.broadcast %cst : f32 to vector<8x8xf32>
    %10 = arith.cmpf ogt, %8, %9 : vector<8x8xf32>
    %11 = arith.andi %6, %10 : vector<8x8xi1>
    %cst_5 = arith.constant 0.000000e+00 : f32
    %cst_6 = arith.constant -1.000000e+09 : f32
    %12 = vector.broadcast %cst_5 : f32 to vector<8x8xf32>
    %13 = vector.broadcast %cst_6 : f32 to vector<8x8xf32>
    %14 = arith.select %11, %12, %13 : vector<8x8xi1>, vector<8x8xf32>
    %15 = arith.truncf %1 : vector<8x32xf32> to vector<8x32xbf16>
    %c0_7 = arith.constant 0 : index
    %c0_8 = arith.constant 0 : index
    %16 = vector.load %arg3[%c0_7, %c0_8] : memref<32x96xbf16, #tpu.memory_space<vmem>>, vector<32x96xbf16>
    %cst_9 = arith.constant dense<0.000000e+00> : vector<8x96xf32>
    %17 = tpu.matmul %15, %16, %cst_9 {dimension_numbers = #tpu.dot_dimension_numbers<[1], [0], [0], [1], [0, 0, 1, 1], [], []>} : vector<8x32xbf16>, vector<32x96xbf16>, vector<8x96xf32> -> vector<8x96xf32>
    %c0_10 = arith.constant 0 : index
    %c0_11 = arith.constant 0 : index
    %18 = vector.load %arg4[%c0_10, %c0_11] : memref<1x96xf32, #tpu.memory_space<vmem>>, vector<1x96xf32>
    %19 = vector.broadcast %18 : vector<1x96xf32> to vector<8x96xf32>
    %20 = arith.addf %17, %19 : vector<8x96xf32>
    %cst_12 = arith.constant 8.000000e+00 : f32
    %21 = math.sqrt %cst_12 : f32
    %cst_13 = arith.constant 1.000000e+00 : f32
    %22 = arith.divf %cst_13, %21 : f32
    %c0_14 = arith.constant 0 : index
    %c0_15 = arith.constant 0 : index
    %23 = vector.load %arg6[%c0_14, %c0_15] : memref<1x32xf32, #tpu.memory_space<vmem>>, vector<1x32xf32>
    %24 = vector.shape_cast %23 : vector<1x32xf32> to vector<1x32xf32>
    %25 = vector.broadcast %24 : vector<1x32xf32> to vector<8x32xf32>
    %26 = vector.extract_strided_slice %20 {offsets = [0, 0], sizes = [8, 8], strides = [1, 1]} : vector<8x96xf32> to vector<8x8xf32>
    %27 = vector.extract_strided_slice %20 {offsets = [0, 32], sizes = [8, 8], strides = [1, 1]} : vector<8x96xf32> to vector<8x8xf32>
    %28 = vector.extract_strided_slice %20 {offsets = [0, 64], sizes = [8, 8], strides = [1, 1]} : vector<8x96xf32> to vector<8x8xf32>
    %cst_16 = arith.constant dense<0.000000e+00> : vector<8x8xf32>
    %29 = tpu.matmul %26, %27, %cst_16 {dimension_numbers = #tpu.dot_dimension_numbers<[1], [1], [0], [0], [0, 0, 1, 0], [], []>} : vector<8x8xf32>, vector<8x8xf32>, vector<8x8xf32> -> vector<8x8xf32>
    %30 = vector.broadcast %22 : f32 to vector<8x8xf32>
    %31 = arith.mulf %29, %30 : vector<8x8xf32>
    %32 = arith.addf %31, %14 : vector<8x8xf32>
    %cst_17 = arith.constant dense<0xFF800000> : vector<8xf32>
    %33 = vector.multi_reduction <maximumf>, %32, %cst_17 [1] : vector<8x8xf32> to vector<8xf32>
    %34 = vector.shape_cast %33 : vector<8xf32> to vector<8x1xf32>
    %35 = vector.broadcast %34 : vector<8x1xf32> to vector<8x8xf32>
    %36 = arith.subf %32, %35 : vector<8x8xf32>
    %37 = math.exp %36 : vector<8x8xf32>
    %cst_18 = arith.constant dense<0.000000e+00> : vector<8xf32>
    %38 = vector.multi_reduction <add>, %37, %cst_18 [1] : vector<8x8xf32> to vector<8xf32>
    %39 = vector.shape_cast %38 : vector<8xf32> to vector<8x1xf32>
    %40 = tpu.reciprocal %39 {approx = true} : vector<8x1xf32> -> vector<8x1xf32>
    %41 = vector.broadcast %40 : vector<8x1xf32> to vector<8x8xf32>
    %42 = arith.mulf %37, %41 : vector<8x8xf32>
    %cst_19 = arith.constant dense<0.000000e+00> : vector<8x8xf32>
    %43 = tpu.matmul %42, %28, %cst_19 {dimension_numbers = #tpu.dot_dimension_numbers<[1], [0], [0], [1], [0, 0, 1, 1], [], []>} : vector<8x8xf32>, vector<8x8xf32>, vector<8x8xf32> -> vector<8x8xf32>
    %44 = arith.truncf %43 : vector<8x8xf32> to vector<8x8xbf16>
    %c0_20 = arith.constant 0 : index
    %c0_21 = arith.constant 0 : index
    %45 = vector.load %arg5[%c0_20, %c0_21] : memref<32x32xbf16, #tpu.memory_space<vmem>>, vector<8x32xbf16>
    %cst_22 = arith.constant dense<0.000000e+00> : vector<8x32xf32>
    %46 = tpu.matmul %44, %45, %cst_22 {dimension_numbers = #tpu.dot_dimension_numbers<[1], [0], [0], [1], [0, 0, 1, 1], [], []>} : vector<8x8xbf16>, vector<8x32xbf16>, vector<8x32xf32> -> vector<8x32xf32>
    %47 = arith.addf %25, %46 : vector<8x32xf32>
    %48 = vector.extract_strided_slice %20 {offsets = [0, 8], sizes = [8, 8], strides = [1, 1]} : vector<8x96xf32> to vector<8x8xf32>
    %49 = vector.extract_strided_slice %20 {offsets = [0, 40], sizes = [8, 8], strides = [1, 1]} : vector<8x96xf32> to vector<8x8xf32>
    %50 = vector.extract_strided_slice %20 {offsets = [0, 72], sizes = [8, 8], strides = [1, 1]} : vector<8x96xf32> to vector<8x8xf32>
    %cst_23 = arith.constant dense<0.000000e+00> : vector<8x8xf32>
    %51 = tpu.matmul %48, %49, %cst_23 {dimension_numbers = #tpu.dot_dimension_numbers<[1], [1], [0], [0], [0, 0, 1, 0], [], []>} : vector<8x8xf32>, vector<8x8xf32>, vector<8x8xf32> -> vector<8x8xf32>
    %52 = vector.broadcast %22 : f32 to vector<8x8xf32>
    %53 = arith.mulf %51, %52 : vector<8x8xf32>
    %54 = arith.addf %53, %14 : vector<8x8xf32>
    %cst_24 = arith.constant dense<0xFF800000> : vector<8xf32>
    %55 = vector.multi_reduction <maximumf>, %54, %cst_24 [1] : vector<8x8xf32> to vector<8xf32>
    %56 = vector.shape_cast %55 : vector<8xf32> to vector<8x1xf32>
    %57 = vector.broadcast %56 : vector<8x1xf32> to vector<8x8xf32>
    %58 = arith.subf %54, %57 : vector<8x8xf32>
    %59 = math.exp %58 : vector<8x8xf32>
    %cst_25 = arith.constant dense<0.000000e+00> : vector<8xf32>
    %60 = vector.multi_reduction <add>, %59, %cst_25 [1] : vector<8x8xf32> to vector<8xf32>
    %61 = vector.shape_cast %60 : vector<8xf32> to vector<8x1xf32>
    %62 = tpu.reciprocal %61 {approx = true} : vector<8x1xf32> -> vector<8x1xf32>
    %63 = vector.broadcast %62 : vector<8x1xf32> to vector<8x8xf32>
    %64 = arith.mulf %59, %63 : vector<8x8xf32>
    %cst_26 = arith.constant dense<0.000000e+00> : vector<8x8xf32>
    %65 = tpu.matmul %64, %50, %cst_26 {dimension_numbers = #tpu.dot_dimension_numbers<[1], [0], [0], [1], [0, 0, 1, 1], [], []>} : vector<8x8xf32>, vector<8x8xf32>, vector<8x8xf32> -> vector<8x8xf32>
    %66 = arith.truncf %65 : vector<8x8xf32> to vector<8x8xbf16>
    %c8 = arith.constant 8 : index
    %c0_27 = arith.constant 0 : index
    %67 = vector.load %arg5[%c8, %c0_27] : memref<32x32xbf16, #tpu.memory_space<vmem>>, vector<8x32xbf16>
    %cst_28 = arith.constant dense<0.000000e+00> : vector<8x32xf32>
    %68 = tpu.matmul %66, %67, %cst_28 {dimension_numbers = #tpu.dot_dimension_numbers<[1], [0], [0], [1], [0, 0, 1, 1], [], []>} : vector<8x8xbf16>, vector<8x32xbf16>, vector<8x32xf32> -> vector<8x32xf32>
    %69 = arith.addf %47, %68 : vector<8x32xf32>
    %70 = vector.extract_strided_slice %20 {offsets = [0, 16], sizes = [8, 8], strides = [1, 1]} : vector<8x96xf32> to vector<8x8xf32>
    %71 = vector.extract_strided_slice %20 {offsets = [0, 48], sizes = [8, 8], strides = [1, 1]} : vector<8x96xf32> to vector<8x8xf32>
    %72 = vector.extract_strided_slice %20 {offsets = [0, 80], sizes = [8, 8], strides = [1, 1]} : vector<8x96xf32> to vector<8x8xf32>
    %cst_29 = arith.constant dense<0.000000e+00> : vector<8x8xf32>
    %73 = tpu.matmul %70, %71, %cst_29 {dimension_numbers = #tpu.dot_dimension_numbers<[1], [1], [0], [0], [0, 0, 1, 0], [], []>} : vector<8x8xf32>, vector<8x8xf32>, vector<8x8xf32> -> vector<8x8xf32>
    %74 = vector.broadcast %22 : f32 to vector<8x8xf32>
    %75 = arith.mulf %73, %74 : vector<8x8xf32>
    %76 = arith.addf %75, %14 : vector<8x8xf32>
    %cst_30 = arith.constant dense<0xFF800000> : vector<8xf32>
    %77 = vector.multi_reduction <maximumf>, %76, %cst_30 [1] : vector<8x8xf32> to vector<8xf32>
    %78 = vector.shape_cast %77 : vector<8xf32> to vector<8x1xf32>
    %79 = vector.broadcast %78 : vector<8x1xf32> to vector<8x8xf32>
    %80 = arith.subf %76, %79 : vector<8x8xf32>
    %81 = math.exp %80 : vector<8x8xf32>
    %cst_31 = arith.constant dense<0.000000e+00> : vector<8xf32>
    %82 = vector.multi_reduction <add>, %81, %cst_31 [1] : vector<8x8xf32> to vector<8xf32>
    %83 = vector.shape_cast %82 : vector<8xf32> to vector<8x1xf32>
    %84 = tpu.reciprocal %83 {approx = true} : vector<8x1xf32> -> vector<8x1xf32>
    %85 = vector.broadcast %84 : vector<8x1xf32> to vector<8x8xf32>
    %86 = arith.mulf %81, %85 : vector<8x8xf32>
    %cst_32 = arith.constant dense<0.000000e+00> : vector<8x8xf32>
    %87 = tpu.matmul %86, %72, %cst_32 {dimension_numbers = #tpu.dot_dimension_numbers<[1], [0], [0], [1], [0, 0, 1, 1], [], []>} : vector<8x8xf32>, vector<8x8xf32>, vector<8x8xf32> -> vector<8x8xf32>
    %88 = arith.truncf %87 : vector<8x8xf32> to vector<8x8xbf16>
    %c16 = arith.constant 16 : index
    %c0_33 = arith.constant 0 : index
    %89 = vector.load %arg5[%c16, %c0_33] : memref<32x32xbf16, #tpu.memory_space<vmem>>, vector<8x32xbf16>
    %cst_34 = arith.constant dense<0.000000e+00> : vector<8x32xf32>
    %90 = tpu.matmul %88, %89, %cst_34 {dimension_numbers = #tpu.dot_dimension_numbers<[1], [0], [0], [1], [0, 0, 1, 1], [], []>} : vector<8x8xbf16>, vector<8x32xbf16>, vector<8x32xf32> -> vector<8x32xf32>
    %91 = arith.addf %69, %90 : vector<8x32xf32>
    %92 = vector.extract_strided_slice %20 {offsets = [0, 24], sizes = [8, 8], strides = [1, 1]} : vector<8x96xf32> to vector<8x8xf32>
    %93 = vector.extract_strided_slice %20 {offsets = [0, 56], sizes = [8, 8], strides = [1, 1]} : vector<8x96xf32> to vector<8x8xf32>
    %94 = vector.extract_strided_slice %20 {offsets = [0, 88], sizes = [8, 8], strides = [1, 1]} : vector<8x96xf32> to vector<8x8xf32>
    %cst_35 = arith.constant dense<0.000000e+00> : vector<8x8xf32>
    %95 = tpu.matmul %92, %93, %cst_35 {dimension_numbers = #tpu.dot_dimension_numbers<[1], [1], [0], [0], [0, 0, 1, 0], [], []>} : vector<8x8xf32>, vector<8x8xf32>, vector<8x8xf32> -> vector<8x8xf32>
    %96 = vector.broadcast %22 : f32 to vector<8x8xf32>
    %97 = arith.mulf %95, %96 : vector<8x8xf32>
    %98 = arith.addf %97, %14 : vector<8x8xf32>
    %cst_36 = arith.constant dense<0xFF800000> : vector<8xf32>
    %99 = vector.multi_reduction <maximumf>, %98, %cst_36 [1] : vector<8x8xf32> to vector<8xf32>
    %100 = vector.shape_cast %99 : vector<8xf32> to vector<8x1xf32>
    %101 = vector.broadcast %100 : vector<8x1xf32> to vector<8x8xf32>
    %102 = arith.subf %98, %101 : vector<8x8xf32>
    %103 = math.exp %102 : vector<8x8xf32>
    %cst_37 = arith.constant dense<0.000000e+00> : vector<8xf32>
    %104 = vector.multi_reduction <add>, %103, %cst_37 [1] : vector<8x8xf32> to vector<8xf32>
    %105 = vector.shape_cast %104 : vector<8xf32> to vector<8x1xf32>
    %106 = tpu.reciprocal %105 {approx = true} : vector<8x1xf32> -> vector<8x1xf32>
    %107 = vector.broadcast %106 : vector<8x1xf32> to vector<8x8xf32>
    %108 = arith.mulf %103, %107 : vector<8x8xf32>
    %cst_38 = arith.constant dense<0.000000e+00> : vector<8x8xf32>
    %109 = tpu.matmul %108, %94, %cst_38 {dimension_numbers = #tpu.dot_dimension_numbers<[1], [0], [0], [1], [0, 0, 1, 1], [], []>} : vector<8x8xf32>, vector<8x8xf32>, vector<8x8xf32> -> vector<8x8xf32>
    %110 = arith.truncf %109 : vector<8x8xf32> to vector<8x8xbf16>
    %c24 = arith.constant 24 : index
    %c0_39 = arith.constant 0 : index
    %111 = vector.load %arg5[%c24, %c0_39] : memref<32x32xbf16, #tpu.memory_space<vmem>>, vector<8x32xbf16>
    %cst_40 = arith.constant dense<0.000000e+00> : vector<8x32xf32>
    %112 = tpu.matmul %110, %111, %cst_40 {dimension_numbers = #tpu.dot_dimension_numbers<[1], [0], [0], [1], [0, 0, 1, 1], [], []>} : vector<8x8xbf16>, vector<8x32xbf16>, vector<8x32xf32> -> vector<8x32xf32>
    %113 = arith.addf %91, %112 : vector<8x32xf32>
    %114 = arith.addf %113, %1 : vector<8x32xf32>
    %c0_41 = arith.constant 0 : index
    %c0_42 = arith.constant 0 : index
    %115 = vector.load %arg7[%c0_41, %c0_42] : memref<1x32xf32, #tpu.memory_space<vmem>>, vector<1x32xf32>
    %c0_43 = arith.constant 0 : index
    %c0_44 = arith.constant 0 : index
    %116 = vector.load %arg8[%c0_43, %c0_44] : memref<1x32xf32, #tpu.memory_space<vmem>>, vector<1x32xf32>
    %cst_45 = arith.constant dense<0.000000e+00> : vector<8xf32>
    %117 = vector.multi_reduction <add>, %114, %cst_45 [1] : vector<8x32xf32> to vector<8xf32>
    %118 = vector.shape_cast %117 : vector<8xf32> to vector<8x1xf32>
    %cst_46 = arith.constant 3.200000e+01 : f32
    %119 = vector.broadcast %cst_46 : f32 to vector<8x1xf32>
    %120 = arith.divf %118, %119 : vector<8x1xf32>
    %121 = vector.broadcast %120 : vector<8x1xf32> to vector<8x32xf32>
    %122 = arith.subf %114, %121 : vector<8x32xf32>
    %123 = arith.mulf %122, %122 : vector<8x32xf32>
    %cst_47 = arith.constant dense<0.000000e+00> : vector<8xf32>
    %124 = vector.multi_reduction <add>, %123, %cst_47 [1] : vector<8x32xf32> to vector<8xf32>
    %125 = vector.shape_cast %124 : vector<8xf32> to vector<8x1xf32>
    %cst_48 = arith.constant 3.200000e+01 : f32
    %126 = vector.broadcast %cst_48 : f32 to vector<8x1xf32>
    %127 = arith.divf %125, %126 : vector<8x1xf32>
    %cst_49 = arith.constant 9.99999996E-13 : f32
    %128 = vector.broadcast %cst_49 : f32 to vector<8x1xf32>
    %129 = arith.addf %127, %128 : vector<8x1xf32>
    %130 = math.rsqrt %129 : vector<8x1xf32>
    %131 = vector.broadcast %120 : vector<8x1xf32> to vector<8x32xf32>
    %132 = arith.subf %114, %131 : vector<8x32xf32>
    %133 = vector.broadcast %130 : vector<8x1xf32> to vector<8x32xf32>
    %134 = arith.mulf %132, %133 : vector<8x32xf32>
    %135 = vector.broadcast %115 : vector<1x32xf32> to vector<8x32xf32>
    %136 = arith.mulf %134, %135 : vector<8x32xf32>
    %137 = vector.broadcast %116 : vector<1x32xf32> to vector<8x32xf32>
    %138 = arith.addf %136, %137 : vector<8x32xf32>
    %139 = arith.truncf %138 : vector<8x32xf32> to vector<8x32xbf16>
    %c0_50 = arith.constant 0 : index
    %c0_51 = arith.constant 0 : index
    %140 = vector.load %arg9[%c0_50, %c0_51] : memref<32x64xbf16, #tpu.memory_space<vmem>>, vector<32x64xbf16>
    %cst_52 = arith.constant dense<0.000000e+00> : vector<8x64xf32>
    %141 = tpu.matmul %139, %140, %cst_52 {dimension_numbers = #tpu.dot_dimension_numbers<[1], [0], [0], [1], [0, 0, 1, 1], [], []>} : vector<8x32xbf16>, vector<32x64xbf16>, vector<8x64xf32> -> vector<8x64xf32>
    %c0_53 = arith.constant 0 : index
    %c0_54 = arith.constant 0 : index
    %142 = vector.load %arg10[%c0_53, %c0_54] : memref<1x64xf32, #tpu.memory_space<vmem>>, vector<1x64xf32>
    %143 = vector.broadcast %142 : vector<1x64xf32> to vector<8x64xf32>
    %144 = arith.addf %141, %143 : vector<8x64xf32>
    %cst_55 = arith.constant 5.000000e-01 : f32
    %145 = vector.broadcast %cst_55 : f32 to vector<8x64xf32>
    %146 = arith.mulf %145, %144 : vector<8x64xf32>
    %cst_56 = arith.constant 4.471500e-02 : f32
    %147 = vector.broadcast %cst_56 : f32 to vector<8x64xf32>
    %148 = arith.mulf %147, %144 : vector<8x64xf32>
    %149 = arith.mulf %148, %144 : vector<8x64xf32>
    %150 = arith.mulf %149, %144 : vector<8x64xf32>
    %151 = arith.addf %144, %150 : vector<8x64xf32>
    %cst_57 = arith.constant 0.797884583 : f32
    %152 = vector.broadcast %cst_57 : f32 to vector<8x64xf32>
    %153 = arith.mulf %152, %151 : vector<8x64xf32>
    %154 = math.tanh %153 : vector<8x64xf32>
    %cst_58 = arith.constant 1.000000e+00 : f32
    %155 = vector.broadcast %cst_58 : f32 to vector<8x64xf32>
    %156 = arith.addf %155, %154 : vector<8x64xf32>
    %157 = arith.mulf %146, %156 : vector<8x64xf32>
    %158 = arith.truncf %157 : vector<8x64xf32> to vector<8x64xbf16>
    %c0_59 = arith.constant 0 : index
    %c0_60 = arith.constant 0 : index
    %159 = vector.load %arg11[%c0_59, %c0_60] : memref<64x32xbf16, #tpu.memory_space<vmem>>, vector<64x32xbf16>
    %cst_61 = arith.constant dense<0.000000e+00> : vector<8x32xf32>
    %160 = tpu.matmul %158, %159, %cst_61 {dimension_numbers = #tpu.dot_dimension_numbers<[1], [0], [0], [1], [0, 0, 1, 1], [], []>} : vector<8x64xbf16>, vector<64x32xbf16>, vector<8x32xf32> -> vector<8x32xf32>
    %c0_62 = arith.constant 0 : index
    %c0_63 = arith.constant 0 : index
    %161 = vector.load %arg12[%c0_62, %c0_63] : memref<1x32xf32, #tpu.memory_space<vmem>>, vector<1x32xf32>
    %162 = vector.broadcast %161 : vector<1x32xf32> to vector<8x32xf32>
    %163 = arith.addf %160, %162 : vector<8x32xf32>
    %164 = arith.addf %163, %138 : vector<8x32xf32>
    %c0_64 = arith.constant 0 : index
    %c0_65 = arith.constant 0 : index
    %165 = vector.load %arg13[%c0_64, %c0_65] : memref<1x32xf32, #tpu.memory_space<vmem>>, vector<1x32xf32>
    %c0_66 = arith.constant 0 : index
    %c0_67 = arith.constant 0 : index
    %166 = vector.load %arg14[%c0_66, %c0_67] : memref<1x32xf32, #tpu.memory_space<vmem>>, vector<1x32xf32>
    %cst_68 = arith.constant dense<0.000000e+00> : vector<8xf32>
    %167 = vector.multi_reduction <add>, %164, %cst_68 [1] : vector<8x32xf32> to vector<8xf32>
    %168 = vector.shape_cast %167 : vector<8xf32> to vector<8x1xf32>
    %cst_69 = arith.constant 3.200000e+01 : f32
    %169 = vector.broadcast %cst_69 : f32 to vector<8x1xf32>
    %170 = arith.divf %168, %169 : vector<8x1xf32>
    %171 = vector.broadcast %170 : vector<8x1xf32> to vector<8x32xf32>
    %172 = arith.subf %164, %171 : vector<8x32xf32>
    %173 = arith.mulf %172, %172 : vector<8x32xf32>
    %cst_70 = arith.constant dense<0.000000e+00> : vector<8xf32>
    %174 = vector.multi_reduction <add>, %173, %cst_70 [1] : vector<8x32xf32> to vector<8xf32>
    %175 = vector.shape_cast %174 : vector<8xf32> to vector<8x1xf32>
    %cst_71 = arith.constant 3.200000e+01 : f32
    %176 = vector.broadcast %cst_71 : f32 to vector<8x1xf32>
    %177 = arith.divf %175, %176 : vector<8x1xf32>
    %cst_72 = arith.constant 9.99999996E-13 : f32
    %178 = vector.broadcast %cst_72 : f32 to vector<8x1xf32>
    %179 = arith.addf %177, %178 : vector<8x1xf32>
    %180 = math.rsqrt %179 : vector<8x1xf32>
    %181 = vector.broadcast %170 : vector<8x1xf32> to vector<8x32xf32>
    %182 = arith.subf %164, %181 : vector<8x32xf32>
    %183 = vector.broadcast %180 : vector<8x1xf32> to vector<8x32xf32>
    %184 = arith.mulf %182, %183 : vector<8x32xf32>
    %185 = vector.broadcast %165 : vector<1x32xf32> to vector<8x32xf32>
    %186 = arith.mulf %184, %185 : vector<8x32xf32>
    %187 = vector.broadcast %166 : vector<1x32xf32> to vector<8x32xf32>
    %188 = arith.addf %186, %187 : vector<8x32xf32>
    %c0_73 = arith.constant 0 : index
    %c0_74 = arith.constant 0 : index
    %c0_75 = arith.constant 0 : index
    %189 = vector.load %arg15[%c0_73, %c0_74, %c0_75] : memref<1x8x32xf32, #tpu.memory_space<vmem>>, vector<1x8x32xf32>
    %190 = vector.shape_cast %189 : vector<1x8x32xf32> to vector<8x32xf32>
    %191 = vector.shape_cast %188 : vector<8x32xf32> to vector<1x8x32xf32>
    tpu.vector_store %arg15[%c0_73, %c0_74, %c0_75], %191 {strides = array<i32>} : memref<1x8x32xf32, #tpu.memory_space<vmem>>, vector<1x8x32xf32>,
    return
  }
  func.func @transform_0(%arg0: i32) -> (i32, i32, i32) {
    %c0_i32 = arith.constant 0 : i32
    %c0_i32_0 = arith.constant 0 : i32
    %c0_i32_1 = arith.constant 0 : i32
    return %arg0, %c0_i32, %c0_i32_0 : i32, i32, i32
  }
  func.func @transform_1(%arg0: i32) -> (i32, i32, i32) {
    %c0_i32 = arith.constant 0 : i32
    %c0_i32_0 = arith.constant 0 : i32
    %c0_i32_1 = arith.constant 0 : i32
    return %arg0, %c0_i32, %c0_i32_0 : i32, i32, i32
  }
  func.func @transform_2(%arg0: i32) -> (i32, i32) {
    %c0_i32 = arith.constant 0 : i32
    %c0_i32_0 = arith.constant 0 : i32
    %c0_i32_1 = arith.constant 0 : i32
    return %c0_i32, %c0_i32_0 : i32, i32
  }
  func.func @transform_3(%arg0: i32) -> (i32, i32) {
    %c0_i32 = arith.constant 0 : i32
    %c0_i32_0 = arith.constant 0 : i32
    %c0_i32_1 = arith.constant 0 : i32
    return %c0_i32, %c0_i32_0 : i32, i32
  }
  func.func @transform_4(%arg0: i32) -> (i32, i32) {
    %c0_i32 = arith.constant 0 : i32
    %c0_i32_0 = arith.constant 0 : i32
    %c0_i32_1 = arith.constant 0 : i32
    return %c0_i32, %c0_i32_0 : i32, i32
  }
  func.func @transform_5(%arg0: i32) -> (i32, i32) {
    %c0_i32 = arith.constant 0 : i32
    %c0_i32_0 = arith.constant 0 : i32
    %c0_i32_1 = arith.constant 0 : i32
    return %c0_i32, %c0_i32_0 : i32, i32
  }
  func.func @transform_6(%arg0: i32) -> (i32, i32) {
    %c0_i32 = arith.constant 0 : i32
    %c0_i32_0 = arith.constant 0 : i32
    %c0_i32_1 = arith.constant 0 : i32
    return %c0_i32, %c0_i32_0 : i32, i32
  }
  func.func @transform_7(%arg0: i32) -> (i32, i32) {
    %c0_i32 = arith.constant 0 : i32
    %c0_i32_0 = arith.constant 0 : i32
    %c0_i32_1 = arith.constant 0 : i32
    return %c0_i32, %c0_i32_0 : i32, i32
  }
  func.func @transform_8(%arg0: i32) -> (i32, i32) {
    %c0_i32 = arith.constant 0 : i32
    %c0_i32_0 = arith.constant 0 : i32
    %c0_i32_1 = arith.constant 0 : i32
    return %c0_i32, %c0_i32_0 : i32, i32
  }
  func.func @transform_9(%arg0: i32) -> (i32, i32) {
    %c0_i32 = arith.constant 0 : i32
    %c0_i32_0 = arith.constant 0 : i32
    %c0_i32_1 = arith.constant 0 : i32
    return %c0_i32, %c0_i32_0 : i32, i32
  }
  func.func @transform_10(%arg0: i32) -> (i32, i32) {
    %c0_i32 = arith.constant 0 : i32
    %c0_i32_0 = arith.constant 0 : i32
    %c0_i32_1 = arith.constant 0 : i32
    return %c0_i32, %c0_i32_0 : i32, i32
  }
  func.func @transform_11(%arg0: i32) -> (i32, i32) {
    %c0_i32 = arith.constant 0 : i32
    %c0_i32_0 = arith.constant 0 : i32
    %c0_i32_1 = arith.constant 0 : i32
    return %c0_i32, %c0_i32_0 : i32, i32
  }
  func.func @transform_12(%arg0: i32) -> (i32, i32) {
    %c0_i32 = arith.constant 0 : i32
    %c0_i32_0 = arith.constant 0 : i32
    %c0_i32_1 = arith.constant 0 : i32
    return %c0_i32, %c0_i32_0 : i32, i32
  }
  func.func @transform_13(%arg0: i32) -> (i32, i32) {
    %c0_i32 = arith.constant 0 : i32
    %c0_i32_0 = arith.constant 0 : i32
    %c0_i32_1 = arith.constant 0 : i32
    return %c0_i32, %c0_i32_0 : i32, i32
  }
  func.func @transform_14(%arg0: i32) -> (i32, i32, i32) {
    %c0_i32 = arith.constant 0 : i32
    %c0_i32_0 = arith.constant 0 : i32
    %c0_i32_1 = arith.constant 0 : i32
    return %arg0, %c0_i32, %c0_i32_0 : i32, i32, i32
  }
}

</mosaic_0001>

<bundles_post_ra>
// kernel: language_model_forward.7
= control target key start
LH: loop header
LB: loop body
LE: loop exit
PB: predicated region body
PF: predicated region fallthrough
CT: control target
= control target key end

     0   :  { %8 = vsyncpa [#allocation3], 0  ;;  %s572_s0 = inlined_call_operand.vmem [shape: f32[16,32], index: 0, kind: input, shape index: {}]   ;;  %s573_s1 = inlined_call_operand.vmem [shape: bf16[32,128], index: 1, kind: input, shape index: {}]   ;;  %s574_s2 = inlined_call_operand.vmem [shape: f32[1,128], index: 2, kind: input, shape index: {}]   ;;  %s575_s3 = inlined_call_operand.hbm [shape: f32[16,128], index: 3, kind: output, shape index: {}]  }
   0x1   :  { %10 = vsyncpa [#allocation3 + $0x1], 0  ;;  %s476_s12 = smov 0   ;;  %s478_s13 = smov 0  }
   0x2   :  { %s480_s14 = smov 0   ;;  %s482_s15 = smov 0  }
   0x3 LB: > { %s497_s16 = sadd.s32 4294967295, %s451_s15   ;;  %s319_s17 = sadd.s32 4294967294, %s451_s15   ;;  %s451_s15 = sphi %s482_s15, %s581_s15   ;;  %s447_s14 = sphi %s480_s14, %s580_s14   ;;  %s443_s13 = sphi %s478_s13, %s579_s13   ;;  %s439_s12 = sphi %s476_s12, %s578_s12  }
   0x4   : > { %s501_s18 = sadd.s32 1, %s451_s15   ;;  %s91_s19 = sadd.s32 1, %s447_s14 }
   0x5   : > { %s88_s20 = ssub.s32 %s451_s15, %s501_s18  ;;  %p101_p0 = scmp.ne.s32.totalorder %s447_s14, %s443_s13 }
   0x6   : > { %p89_p1 = scmp.eq.s32.totalorder %s88_s20, 0  ;;  %p102_p2 = scmp.eq.s32.totalorder %s497_s16, 1 }
   0x7   : > { %p107_p3 = scmp.ne.s32.totalorder %s443_s13, %s439_s12  ;;  %p108_p4 = scmp.eq.s32.totalorder %s319_s17, 1 }
   0x8   : > { %s512_s21 = scalar_select %p89_p1, %s447_s14, %s91_s19  }
   0x9   : > { %p514_p5 = por %p102_p2, %p101_p0  ;;  %p518_p6 = por %p108_p4, %p107_p3 }
   0xa   : > { %p322_p7 = scmp.ge.s32.totalorder %s451_s15, 1  ;;  %p139_p8 = scmp.lt.s32.totalorder %s451_s15, 3 }
   0xc   : > { %p140_p9 = pnand %p322_p7, %p139_p8 }
   0xd   : > { %p162_p10 = scmp.lt.s32.totalorder (!%p140_p9), %s497_s16, 1  ;;  %s159_s8 = sand.u32 (!%p140_p9), 1, %s443_s13  }
   0xe   : > { %143 = sbr.rel (%p140_p9) target bundleno = 546 (0x222), region = 32  ;;  %s323_s9 = sshll.u32 (!%p140_p9), %s159_s8, 3 }
   0xf   : > { %s330_s10 = sshll.u32 (!%p140_p9), %s497_s16, 7  ;;  %s161_s11 = scalar_lea.vmem (!%p140_p9), [#allocation2], %s323_s9 }
  0x10   : > { %s260_s17 = sshll.u32 (!%p140_p9), %s161_s11, 4  ;;  %s258_s24 = scalar_lea.hbm (!%p140_p9), %s575_s3, %s330_s10  ;;  %s261_s17 = int_to_ptr.vmem [resolvable:$true] %s260_s17 }
  0x11   : > { %s247_s25 = scalar_lea.sflag (!%p140_p9), [#allocation3], %s159_s8  ;;  %s391_s26 = scalar_lea.vmem (!%p140_p9), %s261_s17, 128 }
  0x12   : > { %p392_p11 = scmp.ne.s32.totalorder (!%p140_p9), %s261_s17, %s391_s26  ;;  %s455_s27 = smov (!%p140_p9), [#allocation2]  }
  0x13   : > { %v385_v0 = vld [vmem:[%s573_s1 + $0x8] sm:$0xff]   ;;  %v453_v1 = vmov 0.0   ;;  %v386_v2 = vld [vmem:[%s573_s1] sm:$0xff]   ;;  %vm454_vm0 = vmmov 0   ;;  %s163_s28 = scalar_select %p162_p10, %s497_s16, 1  ;;  %vm192_vm1 = vcmask 261120  }
  0x14   : > { %336 = vmatprep.subr.bf16.mxu0 %v453_v1  ;;  %340 = vmatprep.mubr.msk.bf16.mxu0 %vm454_vm0, %v453_v1  ;;  %v325_v5 = vld [vmem:[%s574_s2] ss:$0 sm:$0xff]  ;;  %p393_p12 = pnand %p392_p11, %p514_p5 }
  0x15   : > { %337 = vmatpush3.bf16.msra.mxu0 %v385_v0  ;;  %s324_s29 = sshll.u32 %s163_s28, 3  ;;  %s395_s28 = sshll.u32 %s455_s27, 4  ;;  %s396_s28 = int_to_ptr.vmem [resolvable:$false] %s395_s28 }
  0x16   : > { %338 = vmatprep.subr.bf16.mxu0 %v453_v1  ;;  %s165_s5 = scalar_lea.vmem %s572_s0, %s324_s29  ;;  %p394_p13 = pneg %p393_p12 }
  0x17   : > { %v167_v3 = vld [vmem:[%s165_s5] sm:$0xff]  ;;  %s397_s16 = scalar_lea.vmem %s396_s28, 256  ;;  %p398_p0 = scmp.lt.s32.totalorder %s261_s17, %s396_s28 }
  0x18   : > { %v168_v4 = vpack.c.bf16 %v167_v3, %v167_v3  ;;  %p399_p1 = scmp.lt.s32.totalorder %s397_s16, %s391_s26 }
  0x19   : > { %339 = vmatpush3.bf16.msra.mxu0 %v386_v2 }
  0x1a   : > { %p400_p2 = por %p399_p1, %p398_p0 }
  0x1c   : > { %341 = vmatmul.mubr.msk.bf16.vlgmr.msra.gmra.mxu0 %vm192_vm1, %v168_v4  ;;  %p401_p3 = pnand %p400_p2, %p394_p13 }
  0xdc   : > { %v230_v6 = vpop.f32.mrf.mxu0 }
  0xdd   : > { %v231_v7 = vadd.f32 %v325_v5, %v230_v6 }
  0xde   : > { %v342_v8 = vpop.f32.mrf.mxu0 }
  0xdf   : > { %236 = vmax.xlane.f32.xlu0 %v231_v7 }
  0xe0   : > { %v233_v9 = vpop.f32.mrf.mxu0 }
  0xe2   : > { %v343_v10 = vpop.f32.mrf.mxu0 }
 0x168   : > { %v237_v11 = vpop.xlane.xlu0 %236 }
 0x169   : > { %v238_v12 = vsub.f32 %v231_v7, %v237_v11 }
 0x16b   : > { %v239_v13 = vmul.f32 1.442695, %v238_v12 }
 0x16d   : > { %387 = vpow2.f32 %v239_v13 }
 0x17a   : > { %v388_v14 = vpop.eup %387 }
 0x17b   : > { %241 = vadd.xlane.f32.xlu0 %v388_v14 }
 0x204   : > { %v242_v15 = vpop.xlane.xlu0 %241 }
 0x205   : > { %389 = vrcp.f32 %v242_v15 }
 0x212   : > { %v390_v16 = vpop.eup %389 }
 0x213   : > { %v244_v17 = vmul.f32 %v390_v16, %v388_v14 }
 0x215   : > { %245 = vst [vmem:[%s161_s11] sm:$0xff] %v244_v17 }
 0x216   : > { %404 = shalt.err (!%p401_p3)
}
 0x217   : > { %s405_s29 = scalar_lea.hbm %s258_s24, 128  ;;  %s409_s5 = scalar_lea.hbm %s575_s3, 256 }
 0x218   : > { %p406_p4 = scmp.ne.s32.totalorder %s258_s24, %s405_s29  ;;  %p410_p9 = scmp.lt.s32.totalorder %s258_s24, %s575_s3 }
 0x219   : > { %p411_p10 = scmp.lt.s32.totalorder %s409_s5, %s405_s29 }
 0x21a   : > { %p407_p7 = pnand %p406_p4, %p514_p5 }
 0x21b   : > { %p412_p11 = por %p411_p10, %p410_p9 }
 0x21c   : > { %p408_p8 = pneg %p407_p7 }
 0x21e   : > { %p413_p12 = pnand %p412_p11, %p408_p8 }
 0x220   : > { %416 = shalt.err (!%p413_p12)
}
 0x221   : > { %344 = dma.vmem_to_hbm [thread:$0]  (%p514_p5), %s261_s17, 128, %s258_s24, %s247_s25  }
 0x222 PF: > { %p350_p13 = scmp.ge.s32.totalorder %s451_s15, 2  ;;  %s272_s8 = sand.u32 1, %s439_s12  }
 0x223   : > { %s273_s9 = scalar_lea.sflag [#allocation3], %s272_s8 }
 0x224   : > { %p347_p0 = pnand %p350_p13, %p518_p6 }
 0x226   : > { %p348_p1 = pneg %p347_p0 }
 0x228   : > { %434 = dma.done.wait (%p348_p1), %s273_s9, 128  }
 0x229   : > { %436 = vsyncadd (%p348_p1), %s273_s9, 4294967168  ;;  %p13_p2 = scmp.ge.s32.totalorder %s501_s18, 4   ;;  %s578_s12 = smov %s443_s13 }
 0x22a   : > { %s579_s13 = smov %s447_s14  ;;  %s580_s14 = smov %s512_s21 }
 0x22b   : > { %s581_s15 = smov %s501_s18  ;;  %15 = sbr.rel (!%p13_p2) target bundleno = 3 (0x3), region = 67 }
 0x230   :  { %278 = vsyncpa [#allocation3], 1 }
 0x231   :  { %280 = vsyncpa [#allocation3 + $0x1], 1 }

// kernel: language_model_forward.4
= control target key start
LH: loop header
LB: loop body
LE: loop exit
PB: predicated region body
PF: predicated region fallthrough
CT: control target
= control target key end

     0   :  { %s301_s12 = smov 0   ;;  %s327_s0 = inlined_call_operand.vmem [shape: f32[16,32], index: 0, kind: input, shape index: {}]   ;;  %s328_s1 = inlined_call_operand.vmem [shape: f32[1,32], index: 1, kind: input, shape index: {}]   ;;  %s329_s2 = inlined_call_operand.vmem [shape: f32[1,32], index: 2, kind: input, shape index: {}]   ;;  %s330_s3 = inlined_call_operand.vmem [shape: f32[16,32], index: 3, kind: output, shape index: {}]  }
   0x1 LB: > { %s252_s13 = sadd.s32 4294967295, %s279_s12   ;;  %p256_p0 = scmp.ge.s32.totalorder %s279_s12, 1  ;;  %s279_s12 = sphi %s301_s12, %s13_s12  }
   0x2   : > { %p136_p1 = scmp.lt.s32.totalorder %s279_s12, 3 }
   0x4   : > { %p137_p2 = pnand %p256_p0, %p136_p1 }
   0x5   : > { %p158_p3 = scmp.lt.s32.totalorder (!%p137_p2), %s252_s13, 1 }
   0x6   : > { %140 = sbr.rel (%p137_p2) target bundleno = 324 (0x144), region = 32 }
   0xb   : > { %s332_s13 = smov (!%p158_p3, %s252_s13), 1  ;;  %vm169_vm0 = vcmask 261120   ;;  %v259_v11 = vld [vmem:[%s328_s1] ss:$0 sm:$0xff] }
   0xc   : > { %s257_s14 = sshll.u32 %s332_s13, 3  ;;  %v260_v13 = vld [vmem:[%s329_s2] ss:$0 sm:$0xff] }
   0xd   : > { %s161_s17 = scalar_lea.vmem %s327_s0, %s257_s14  ;;  %s165_s24 = scalar_lea.vmem %s330_s3, %s257_s14 }
   0xe   : > { %v166_v0 = vld [vmem:[%s161_s17] sm:$0xff] }
   0xf   : > { %v170_v1 = vsel %vm169_vm0, %v166_v0, 0.0 }
  0x10   : > { %171 = vadd.xlane.f32.xlu0 %v170_v1 }
  0x99   : > { %v172_v2 = vpop.xlane.xlu0 %171 }
  0x9a   : > { %v174_v3 = vmul.f32 0.03125, %v172_v2 }
  0x9c   : > { %v175_v4 = vsub.f32 %v166_v0, %v174_v3 }
  0x9e   : > { %v176_v5 = vmul.f32 %v175_v4, %v175_v4 }
  0xa0   : > { %v177_v6 = vsel %vm169_vm0, %v176_v5, 0.0 }
  0xa1   : > { %178 = vadd.xlane.f32.xlu0 %v177_v6 }
 0x12a   : > { %v179_v7 = vpop.xlane.xlu0 %178 }
 0x12b   : > { %v180_v8 = vmul.f32 0.03125, %v179_v7 }
 0x12d   : > { %v181_v9 = vadd.f32 1e-12, %v180_v8 }
 0x12f   : > { %271 = vrsqrt.f32 %v181_v9 }
 0x13c   : > { %v272_v10 = vpop.eup %271 }
 0x13d   : > { %v183_v12 = vmul.f32 %v272_v10, %v175_v4 }
 0x13f   : > { %v190_v14 = vmul.f32 %v259_v11, %v183_v12 }
 0x141   : > { %v197_v15 = vadd.f32 %v260_v13, %v190_v14 }
 0x143   : > { %198 = vst.msk [vmem:[%s165_s24] sm:$0xff] %vm169_vm0, %v197_v15 }
 0x144 PF: > { %s13_s12 = sadd.s32 1, %s279_s12  }
 0x145   : > { %p10_p4 = scmp.ge.s32.totalorder %s13_s12, 4  }
 0x147   :  { %12 = sbr.rel (!%p10_p4) target bundleno = 1 (0x1), region = 62 }

// kernel: language_model_forward.5
= control target key start
LH: loop header
LB: loop body
LE: loop exit
PB: predicated region body
PF: predicated region fallthrough
CT: control target
= control target key end

     0   :  { %s2039_s29 = smov 0   ;;  %s2248_s0 = inlined_call_operand.vmem [shape: f32[2,1,8], index: 0, kind: input, shape index: {}]   ;;  %s2249_s1 = inlined_call_operand.vmem [shape: f32[2,8,32], index: 1, kind: input, shape index: {}]   ;;  %s2250_s2 = inlined_call_operand.vmem [shape: bf16[32,96], index: 2, kind: input, shape index: {}]   ;;  %s2251_s3 = inlined_call_operand.vmem [shape: f32[1,96], index: 3, kind: input, shape index: {}]   ;;  %s2252_s4 = inlined_call_operand.vmem [shape: bf16[32,32], index: 4, kind: input, shape index: {}]   ;;  %s2253_s5 = inlined_call_operand.vmem [shape: f32[1,32], index: 5, kind: input, shape index: {}]   ;;  %s2254_s6 = inlined_call_operand.vmem [shape: f32[1,32], index: 6, kind: input, shape index: {}]   ;;  %s2255_s7 = inlined_call_operand.vmem [shape: f32[1,32], index: 7, kind: input, shape index: {}]   ;;  %s2256_s8 = inlined_call_operand.vmem [shape: bf16[32,64], index: 8, kind: input, shape index: {}]   ;;  %s2257_s9 = inlined_call_operand.vmem [shape: f32[1,64], index: 9, kind: input, shape index: {}]   ;;  %s2258_s10 = inlined_call_operand.vmem [shape: bf16[64,32], index: 10, kind: input, shape index: {}]   ;;  %s2259_s11 = inlined_call_operand.vmem [shape: f32[1,32], index: 11, kind: input, shape index: {}]   ;;  %s2260_s12 = inlined_call_operand.vmem [shape: f32[1,32], index: 12, kind: input, shape index: {}]   ;;  %s2261_s13 = inlined_call_operand.vmem [shape: f32[1,32], index: 13, kind: input, shape index: {}]   ;;  %s2262_s14 = inlined_call_operand.vmem [shape: f32[2,8,32], index: 14, kind: output, shape index: {}]  }
   0x1 LB: > { %s1718_s30 = sadd.s32 4294967295, %s1948_s29   ;;  %p1722_p0 = scmp.ge.s32.totalorder %s1948_s29, 1  ;;  %s1948_s29 = sphi %s2039_s29, %s24_s29  }
   0x2   : > { %p419_p1 = scmp.lt.s32.totalorder %s1948_s29, 3 }
   0x4   : > { %p420_p2 = pnand %p1722_p0, %p419_p1 }
   0x5   : > { %p466_p3 = scmp.lt.s32.totalorder (!%p420_p2), %s1718_s30, 1  ;;  %s1952_s25 = smov (!%p420_p2), 120  }
   0x6   : > { %423 = sbr.rel (%p420_p2) target bundleno = 3305 (0xce9), region = 76  ;;  %s1953_s26 = smov (!%p420_p2), 96  }
   0x7   : > { %s1954_s27 = smov (!%p420_p2), 88   ;;  %s1956_s17 = smov (!%p420_p2), 80  }
   0x8   : > { %s1957_s18 = smov (!%p420_p2), 112   ;;  %s1958_s20 = smov (!%p420_p2), 56  }
   0x9   : > { %s1959_s21 = smov (!%p420_p2), 48   ;;  %s1961_s23 = smov (!%p420_p2), 72  }
   0xa   : > { %s1962_s24 = smov (!%p420_p2), 64  }
   0xb   : > { %v1912_v0 = vld [vmem:[%s2250_s2 + $0x8] sm:$0xff]   ;;  %v1950_v1 = vmov 0.0   ;;  %v1913_v2 = vld [vmem:[%s2250_s2] sm:$0xff]   ;;  %vm1951_vm0 = vmmov 0   ;;  %s2264_s30 = smov (!%p466_p3, %s1718_s30), 1  ;;  %vm518_vm1 = vcmask 261120   ;;  %v480_v14 = vlaneseq }
   0xc   : > { %1798 = vmatprep.subr.bf16.mxu0 %v1950_v1  ;;  %1811 = vmatprep.subr.mxu1 %v1950_v1  ;;  %s1723_s19 = sshll.u32 %s2264_s30, 3  ;;  %v1726_v5 = vld [vmem:[%s2251_s3] ss:$0 sm:$0xff]  ;;  %vm572_vm2 = vcmask 64512   ;;  %s468_s16 = scalar_lea.vmem %s2248_s0, %s2264_s30  ;;  %v1955_v23 = vmov -1e+09  }
   0xd   : > { %1799 = vmatpush3.bf16.msra.mxu0 %v1912_v0  ;;  %1802 = vmatprep.mubr.msk.bf16.mxu0 %vm1951_vm0, %v1950_v1  ;;  %s472_s22 = scalar_lea.vmem %s2249_s1, %s1723_s19  ;;  %v481_v15 = vshrl.u32 %v480_v14, 7  ;;  %v483_v16 = vand.u32 127, %v480_v14  ;;  %v1725_v17 = vld [vmem:[%s468_s16] ss:$0 sm:$0xff]  ;;  %vm741_vm6 = vcmask 1043456   ;;  %vm1581_vm7 = vcmask 523264  }
   0xe   : > { %1800 = vmatprep.subr.bf16.mxu0 %v1950_v1  ;;  %1813 = vmatprep.mubr.msk.f32.mxu1 %vm1951_vm0, %v1950_v1  ;;  %v2069_v3 = vld [vmem:[%s472_s22] sm:$0xff]  ;;  %vm491_vm4 = vcmp.gt.f32.partialorder %v1725_v17, 0.5  ;;  %s1960_s22 = smov 104  }
   0xf   : > { %v494_v4 = vpack.c.bf16 %v2069_v3, %v2069_v3  ;;  %vm484_vm3 = vcmp.le.s32.totalorder %v483_v16, %v481_v15 }
  0x10   : > { %vm492_vm5 = vmand %vm484_vm3, %vm491_vm4 }
  0x11   : > { %1801 = vmatpush3.bf16.msra.mxu0 %v1913_v2  ;;  %v2101_v24 = vsel %vm492_vm5, 0.0, %v1955_v23 }
  0x12   : > { %1806 = vmatprep.subr.mxu0 %v1950_v1 }
  0x14   : > { %1803 = vmatmul.mubr.msk.bf16.vlgmr.msra.gmra.mxu0 %vm518_vm1, %v494_v4 }
  0x15   : > { %1808 = vmatprep.mubr.msk.f32.mxu0 %vm1951_vm0, %v1950_v1 }
  0xd4   : > { %v556_v6 = vpop.f32.mrf.mxu0 }
  0xd5   : > { %v2079_v7 = vadd.f32 %v1726_v5, %v556_v6 }
  0xd6   : > { %v1804_v8 = vpop.f32.mrf.mxu0 }
  0xd7   : > { %786 = vrot.lane.b32.xlu1 %v2079_v7, %s1952_s25  ;;  %570 = vrot.lane.b32.xlu0 %v2079_v7, %s1953_s26  ;;  %s1963_s25 = smov 40  }
  0xd8   : > { %v559_v9 = vpop.f32.mrf.mxu0 }
  0xda   : > { %v1805_v10 = vpop.f32.mrf.mxu0 }
  0xdb   : > { %788 = vrot.lane.b32.xlu0 %v2079_v7, %s1954_s27 }
 0x149   : > { %v571_v11 = vpop.permute.xlu0 %570  ;;  %v787_v13 = vpop.permute.xlu1 %786 }
 0x14a   : > { %1807 = vmatpush3.xpose.msk.msra.mxu0 %vm572_vm2, %v571_v11 }
 0x14b   : > { %1822 = vmatprep.subr.mxu0 %v1950_v1 }
 0x14d   : > { %1809 = vmatmul.mubr.msk.f32.vlgmr.msra.gmra.mxu0 %vm572_vm2, %v2079_v7  ;;  %v789_v12 = vpop.permute.xlu0 %788 }
 0x14e   : > { %1823 = vmatpush3.xpose.msk.msra.mxu0 %vm572_vm2, %v789_v12  ;;  %1824 = vmatprep.mubr.msk.f32.mxu0 %vm1951_vm0, %v1950_v1 }
 0x14f   : > { %1827 = vmatprep.subr.mxu0 %v1950_v1 }
 0x151   : > { %1825 = vmatmul.mubr.msk.f32.vlgmr.msra.gmra.mxu0 %vm572_vm2, %v787_v13 }
 0x152   : > { %1829 = vmatprep.mubr.msk.f32.mxu0 %vm1951_vm0, %v1950_v1 }
 0x20d   : > { %v2099_v18 = vpop.f32.mrf.mxu0 }
 0x20e   : > { %v647_v51 = vmul.f32 0.35355338, %v2099_v18 }
 0x20f   : > { %v1810_v19 = vpop.f32.mrf.mxu0 }
 0x210   : > { %v648_v52 = vadd.f32 %v647_v51, %v2101_v24  ;;  %v737_v19 = vld [vmem:[%s2252_s4] sm:$0xf] }
 0x211   : > { %v860_v20 = vpop.f32.mrf.mxu0 }
 0x212   : > { %v864_v21 = vmul.f32 0.35355338, %v860_v20  ;;  %v649_v53 = vsel %vm572_vm2, %v648_v52, -inf  ;;  %v743_v20 = vsel %vm741_vm6, %v737_v19, 0  ;;  %v1919_v19 = vld [vmem:[%s2258_s10] sm:$0xff]  }
 0x213   : > { %v1826_v22 = vpop.f32.mrf.mxu0 }
 0x214   : > { %v865_v25 = vadd.f32 %v864_v21, %v2101_v24 }
 0x216   : > { %v866_v26 = vsel %vm572_vm2, %v865_v25, -inf }
 0x217   : > { %867 = vmax.xlane.f32.xlu1 %v866_v26 }
 0x228   : > { %1004 = vrot.lane.b32.xlu1 %v2079_v7, %s1956_s17 }
 0x22c   : > { %1002 = vrot.lane.b32.xlu1 %v2079_v7, %s1957_s18 }
 0x2a0   : > { %v868_v27 = vpop.xlane.xlu1 %867 }
 0x2a1   : > { %v869_v28 = vsub.f32 %v865_v25, %v868_v27 }
 0x2a3   : > { %v870_v29 = vmul.f32 1.442695, %v869_v28 }
 0x2a4   : > { %v1005_v35 = vpop.permute.xlu1 %1004 }
 0x2a5   : > { %1920 = vpow2.f32 %v870_v29  ;;  %v1170_v29 = vld [vmem:[%s2252_s4 + $0x8] sm:$0xf] }
 0x2a8   : > { %v1003_v37 = vpop.permute.xlu1 %1002 }
 0x2b2   : > { %v1921_v30 = vpop.eup %1920 }
 0x2b3   : > { %v872_v31 = vsel %vm572_vm2, %v1921_v30, 0.0 }
 0x2b4   : > { %873 = vadd.xlane.f32.xlu0 %v872_v31  ;;  %v1175_v31 = vsel %vm741_vm6, %v1170_v29, 0 }
 0x2ca   : > { %877 = vrot.lane.b32.xlu0 %v2079_v7, %s1958_s20 }
 0x33d   : > { %v874_v32 = vpop.xlane.xlu0 %873 }
 0x33e   : > { %1922 = vrcp.f32 %v874_v32 }
 0x341   : > { %v878_v33 = vpop.permute.xlu0 %877 }
 0x342   : > { %1828 = vmatpush3.msra.mxu0 %v878_v33  ;;  %v1386_v33 = vld [vmem:[%s2252_s4 + $0xc] sm:$0xf] }
 0x343   : > { %1838 = vmatprep.subr.mxu0 %v1950_v1 }
 0x34b   : > { %v1923_v34 = vpop.eup %1922 }
 0x34c   : > { %v876_v36 = vmul.f32 %v1923_v34, %v1921_v30  ;;  %v1391_v34 = vsel %vm741_vm6, %v1386_v33, 0 }
 0x34e   : > { %1830 = vmatmul.mubr.msk.f32.vlgmr.msra.gmra.mxu0 %vm572_vm2, %v876_v36 }
 0x34f   : > { %1839 = vmatpush3.xpose.msk.msra.mxu0 %vm572_vm2, %v1005_v35  ;;  %1840 = vmatprep.mubr.msk.f32.mxu0 %vm1951_vm0, %v1950_v1 }
 0x350   : > { %1843 = vmatprep.subr.mxu0 %v1950_v1 }
 0x352   : > { %1841 = vmatmul.mubr.msk.f32.vlgmr.msra.gmra.mxu0 %vm572_vm2, %v1003_v37 }
 0x353   : > { %1845 = vmatprep.mubr.msk.f32.mxu0 %vm1951_vm0, %v1950_v1 }
 0x40e   : > { %v2118_v38 = vpop.f32.mrf.mxu0 }
 0x40f   : > { %v953_v30 = vpack.c.bf16 %v2118_v38, %v2118_v38 }
 0x410   : > { %v1831_v39 = vpop.f32.mrf.mxu0 }
 0x412   : > { %v1076_v40 = vpop.f32.mrf.mxu0 }
 0x413   : > { %v1080_v41 = vmul.f32 0.35355338, %v1076_v40  ;;  %v1730_v40 = vld [vmem:[%s2253_s5] ss:$0 sm:$0xff] }
 0x414   : > { %v1842_v42 = vpop.f32.mrf.mxu0 }
 0x415   : > { %v1081_v43 = vadd.f32 %v1080_v41, %v2101_v24 }
 0x417   : > { %v1082_v44 = vsel %vm572_vm2, %v1081_v43, -inf }
 0x418   : > { %1083 = vmax.xlane.f32.xlu0 %v1082_v44 }
 0x42e   : > { %1093 = vrot.lane.b32.xlu0 %v2079_v7, %s1959_s21 }
 0x432   : > { %1218 = vrot.lane.b32.xlu0 %v2079_v7, %s1960_s22 }
 0x4a1   : > { %v1084_v45 = vpop.xlane.xlu0 %1083 }
 0x4a2   : > { %v1085_v46 = vsub.f32 %v1081_v43, %v1084_v45 }
 0x4a4   : > { %v1086_v47 = vmul.f32 1.442695, %v1085_v46 }
 0x4a5   : > { %v1094_v48 = vpop.permute.xlu0 %1093 }
 0x4a6   : > { %1924 = vpow2.f32 %v1086_v47  ;;  %1844 = vmatpush3.msra.mxu0 %v1094_v48 }
 0x4a7   : > { %1854 = vmatprep.subr.mxu0 %v1950_v1 }
 0x4a9   : > { %v1219_v58 = vpop.permute.xlu0 %1218 }
 0x4b3   : > { %v1925_v49 = vpop.eup %1924 }
 0x4b4   : > { %v1088_v50 = vsel %vm572_vm2, %v1925_v49, 0.0 }
 0x4b5   : > { %1089 = vadd.xlane.f32.xlu1 %v1088_v50 }
 0x4c6   : > { %1220 = vrot.lane.b32.xlu1 %v2079_v7, %s1961_s23  ;;  %s476_s23 = scalar_lea.vmem %s2262_s14, %s1723_s19 }
 0x4ea   : > { %650 = vmax.xlane.f32.xlu1 %v649_v53 }
 0x53e   : > { %v1090_v54 = vpop.xlane.xlu1 %1089 }
 0x53f   : > { %1926 = vrcp.f32 %v1090_v54 }
 0x542   : > { %v1221_v57 = vpop.permute.xlu1 %1220 }
 0x54c   : > { %v1927_v55 = vpop.eup %1926 }
 0x54d   : > { %v1092_v56 = vmul.f32 %v1927_v55, %v1925_v49 }
 0x54f   : > { %1846 = vmatmul.mubr.msk.f32.vlgmr.msra.gmra.mxu0 %vm572_vm2, %v1092_v56 }
 0x550   : > { %1855 = vmatpush3.xpose.msk.msra.mxu0 %vm572_vm2, %v1221_v57  ;;  %1856 = vmatprep.mubr.msk.f32.mxu0 %vm1951_vm0, %v1950_v1 }
 0x551   : > { %1859 = vmatprep.subr.mxu0 %v1950_v1 }
 0x553   : > { %1857 = vmatmul.mubr.msk.f32.vlgmr.msra.gmra.mxu0 %vm572_vm2, %v1219_v58 }
 0x554   : > { %1861 = vmatprep.mubr.msk.f32.mxu0 %vm1951_vm0, %v1950_v1 }
 0x573   : > { %v651_v59 = vpop.xlane.xlu1 %650 }
 0x574   : > { %v652_v60 = vsub.f32 %v648_v52, %v651_v59 }
 0x576   : > { %v653_v61 = vmul.f32 1.442695, %v652_v60 }
 0x578   : > { %1928 = vpow2.f32 %v653_v61 }
 0x585   : > { %v1929_v8 = vpop.eup %1928 }
 0x586   : > { %v655_v9 = vsel %vm572_vm2, %v1929_v8, 0.0 }
 0x60f   : > { %v2138_v62 = vpop.f32.mrf.mxu0 }
 0x610   : > { %v1169_v32 = vpack.c.bf16 %v2138_v62, %v2138_v62 }
 0x611   : > { %v1847_v63 = vpop.f32.mrf.mxu0 }
 0x613   : > { %v1292_v0 = vpop.f32.mrf.mxu0 }
 0x614   : > { %v1296_v2 = vmul.f32 0.35355338, %v1292_v0 }
 0x615   : > { %v1858_v4 = vpop.f32.mrf.mxu0 }
 0x616   : > { %v1297_v5 = vadd.f32 %v1296_v2, %v2101_v24  ;;  %v1914_v4 = vld [vmem:[%s2256_s8 + $0x8] sm:$0xff]  }
 0x618   : > { %v1298_v6 = vsel %vm572_vm2, %v1297_v5, -inf }
 0x619   : > { %1299 = vmax.xlane.f32.xlu0 %v1298_v6 }
 0x61d   : > { %656 = vadd.xlane.f32.xlu0 %v655_v9 }
 0x633   : > { %660 = vrot.lane.b32.xlu0 %v2079_v7, %s1962_s24 }
 0x6a2   : > { %v1300_v10 = vpop.xlane.xlu0 %1299 }
 0x6a3   : > { %v1301_v11 = vsub.f32 %v1297_v5, %v1300_v10  ;;  %v1747_v10 = vld [vmem:[%s2254_s6] ss:$0 sm:$0xff] }
 0x6a5   : > { %v1302_v12 = vmul.f32 1.442695, %v1301_v11 }
 0x6a6   : > { %v657_v13 = vpop.xlane.xlu0 %656 }
 0x6a7   : > { %1930 = vpow2.f32 %v1302_v12  ;;  %v1748_v12 = vld [vmem:[%s2255_s7] ss:$0 sm:$0xff] }
 0x6a8   : > { %1932 = vrcp.f32 %v657_v13 }
 0x6aa   : > { %v661_v14 = vpop.permute.xlu0 %660 }
 0x6ab   : > { %1812 = vmatpush3.msra.mxu1 %v661_v14 }
 0x6ac   : > { %1816 = vmatprep.subr.bf16.mxu1 %v1950_v1 }
 0x6b4   : > { %v1931_v15 = vpop.eup %1930 }
 0x6b5   : > { %v1933_v16 = vpop.eup %1932  ;;  %v1304_v17 = vsel %vm572_vm2, %v1931_v15, 0.0 }
 0x6b6   : > { %1305 = vadd.xlane.f32.xlu1 %v1304_v17  ;;  %v659_v18 = vmul.f32 %v1933_v16, %v1929_v8  ;;  %v1916_v16 = vld [vmem:[%s2258_s10 + $0x18] sm:$0xff]   ;;  %v1917_v17 = vld [vmem:[%s2258_s10 + $0x10] sm:$0xff]  }
 0x6b8   : > { %1814 = vmatmul.mubr.msk.f32.vlgmr.msra.gmra.mxu1 %vm572_vm2, %v659_v18  ;;  %v1918_v18 = vld [vmem:[%s2258_s10 + $0x8] sm:$0xff]  }
 0x6b9   : > { %1818 = vmatprep.mubr.msk.bf16.mxu1 %vm1951_vm0, %v1950_v1  ;;  %1817 = vmatpush3.bf16.msra.mxu1 %v743_v20  ;;  %v1749_v20 = vld [vmem:[%s2257_s9] ss:$0 sm:$0xff] }
 0x6ba   : > { %1832 = vmatprep.subr.bf16.mxu1 %v1950_v1 }
 0x6c7   : > { %1309 = vrot.lane.b32.xlu1 %v2079_v7, %s1963_s25  ;;  %v954_v7 = vld [vmem:[%s2252_s4 + $0x4] sm:$0xf] }
 0x6c8   : > { %v959_v27 = vsel %vm741_vm6, %v954_v7, 0 }
 0x73f   : > { %v1306_v21 = vpop.xlane.xlu1 %1305 }
 0x740   : > { %1934 = vrcp.f32 %v1306_v21 }
 0x743   : > { %v1310_v22 = vpop.permute.xlu1 %1309 }
 0x744   : > { %1860 = vmatpush3.msra.mxu0 %v1310_v22 }
 0x745   : > { %1870 = vmatprep.subr.bf16.mxu0 %v1950_v1 }
 0x74d   : > { %v1935_v23 = vpop.eup %1934 }
 0x74e   : > { %v1308_v24 = vmul.f32 %v1935_v23, %v1931_v15 }
 0x750   : > { %1862 = vmatmul.mubr.msk.f32.vlgmr.msra.gmra.mxu0 %vm572_vm2, %v1308_v24 }
 0x751   : > { %1874 = vmatprep.mubr.msk.bf16.mxu0 %vm1951_vm0, %v1950_v1  ;;  %1871 = vmatpush3.bf16.msra.mxu0 %v1914_v4 }
 0x752   : > { %1872 = vmatprep.subr.bf16.mxu0 %v1950_v1 }
 0x778   : > { %v732_v25 = vpop.f32.mrf.mxu1 }
 0x779   : > { %v736_v26 = vpack.c.bf16 %v732_v25, %v732_v25 }
 0x77a   : > { %v1815_v28 = vpop.f32.mrf.mxu1 }
 0x77b   : > { %1819 = vmatmul.mubr.msk.bf16.vlgmr.msra.gmra.mxu1 %vm572_vm2, %v736_v26 }
 0x77c   : > { %1833 = vmatpush3.bf16.msra.mxu1 %v959_v27  ;;  %1834 = vmatprep.mubr.msk.bf16.mxu1 %vm1951_vm0, %v1950_v1 }
 0x77d   : > { %1848 = vmatprep.subr.bf16.mxu1 %v1950_v1 }
 0x783   : > { %1835 = vmatmul.mubr.msk.bf16.vlgmr.msra.gmra.mxu1 %vm572_vm2, %v953_v30 }
 0x784   : > { %1849 = vmatpush3.bf16.msra.mxu1 %v1175_v31  ;;  %1850 = vmatprep.mubr.msk.bf16.mxu1 %vm1951_vm0, %v1950_v1 }
 0x785   : > { %1864 = vmatprep.subr.bf16.mxu1 %v1950_v1 }
 0x78b   : > { %1851 = vmatmul.mubr.msk.bf16.vlgmr.msra.gmra.mxu1 %vm572_vm2, %v1169_v32 }
 0x78c   : > { %1866 = vmatprep.mubr.msk.bf16.mxu1 %vm1951_vm0, %v1950_v1  ;;  %1865 = vmatpush3.bf16.msra.mxu1 %v1391_v34  ;;  %v1753_v34 = vld [vmem:[%s2259_s11] ss:$0 sm:$0xff] }
 0x78d   : > { %1878 = vmatprep.subr.bf16.mxu1 %v1950_v1 }
 0x810   : > { %v1381_v35 = vpop.f32.mrf.mxu0 }
 0x811   : > { %v1385_v36 = vpack.c.bf16 %v1381_v35, %v1381_v35 }
 0x812   : > { %v1863_v37 = vpop.f32.mrf.mxu0 }
 0x813   : > { %1867 = vmatmul.mubr.msk.bf16.vlgmr.msra.gmra.mxu1 %vm572_vm2, %v1385_v36 }
 0x814   : > { %1886 = vmatprep.mubr.msk.bf16.mxu1 %vm1951_vm0, %v1950_v1  ;;  %1879 = vmatpush3.bf16.msra.mxu1 %v1916_v16 }
 0x815   : > { %1880 = vmatprep.subr.bf16.mxu1 %v1950_v1 }
 0x818   : > { %1881 = vmatpush3.bf16.msra.mxu1 %v1917_v17 }
 0x819   : > { %1882 = vmatprep.subr.bf16.mxu1 %v1950_v1 }
 0x81c   : > { %1883 = vmatpush3.bf16.msra.mxu1 %v1918_v18 }
 0x81d   : > { %1884 = vmatprep.subr.bf16.mxu1 %v1950_v1 }
 0x820   : > { %1885 = vmatpush3.bf16.msra.mxu1 %v1919_v19 }
 0x83b   : > { %v779_v38 = vpop.f32.mrf.mxu1 }
 0x83c   : > { %v785_v43 = vadd.f32 %v1730_v40, %v779_v38 }
 0x83d   : > { %v1820_v39 = vpop.f32.mrf.mxu1 }
 0x83f   : > { %v782_v41 = vpop.f32.mrf.mxu1 }
 0x841   : > { %v1821_v42 = vpop.f32.mrf.mxu1 }
 0x843   : > { %v995_v44 = vpop.f32.mrf.mxu1 }
 0x844   : > { %v1001_v45 = vadd.f32 %v995_v44, %v785_v43 }
 0x845   : > { %v1836_v46 = vpop.f32.mrf.mxu1 }
 0x847   : > { %v998_v47 = vpop.f32.mrf.mxu1 }
 0x849   : > { %v1837_v48 = vpop.f32.mrf.mxu1 }
 0x84b   : > { %v1211_v49 = vpop.f32.mrf.mxu1 }
 0x84c   : > { %v1217_v50 = vadd.f32 %v1211_v49, %v1001_v45 }
 0x84d   : > { %v1852_v51 = vpop.f32.mrf.mxu1 }
 0x84e   : > { %v1759_v51 = vld [vmem:[%s2260_s12] ss:$0 sm:$0xff] }
 0x84f   : > { %v1214_v52 = vpop.f32.mrf.mxu1 }
 0x851   : > { %v1853_v53 = vpop.f32.mrf.mxu1 }
 0x852   : > { %v1760_v53 = vld [vmem:[%s2261_s13] ss:$0 sm:$0xff] }
 0x8d3   : > { %v1427_v54 = vpop.f32.mrf.mxu1 }
 0x8d4   : > { %v1433_v55 = vadd.f32 %v1427_v54, %v1217_v50 }
 0x8d5   : > { %v1868_v56 = vpop.f32.mrf.mxu1 }
 0x8d6   : > { %v1434_v57 = vadd.f32 %v1433_v55, %v2069_v3  ;;  %v1915_v3 = vld [vmem:[%s2256_s8] sm:$0xff]  }
 0x8d7   : > { %v1430_v58 = vpop.f32.mrf.mxu1  ;;  %1873 = vmatpush3.bf16.msra.mxu0 %v1915_v3 }
 0x8d8   : > { %v1437_v59 = vsel %vm518_vm1, %v1434_v57, 0.0 }
 0x8d9   : > { %1438 = vadd.xlane.f32.xlu1 %v1437_v59  ;;  %v1869_v60 = vpop.f32.mrf.mxu1 }
 0x962   : > { %v1439_v61 = vpop.xlane.xlu1 %1438 }
 0x963   : > { %v1441_v62 = vmul.f32 0.03125, %v1439_v61 }
 0x965   : > { %v1442_v63 = vsub.f32 %v1434_v57, %v1441_v62 }
 0x967   : > { %v1443_v0 = vmul.f32 %v1442_v63, %v1442_v63 }
 0x969   : > { %v1444_v2 = vsel %vm518_vm1, %v1443_v0, 0.0 }
 0x96a   : > { %1445 = vadd.xlane.f32.xlu0 %v1444_v2 }
 0x9f3   : > { %v1446_v5 = vpop.xlane.xlu0 %1445 }
 0x9f4   : > { %v1447_v6 = vmul.f32 0.03125, %v1446_v5 }
 0x9f6   : > { %v1448_v8 = vadd.f32 1e-12, %v1447_v6 }
 0x9f8   : > { %1936 = vrsqrt.f32 %v1448_v8 }
 0xa05   : > { %v1937_v9 = vpop.eup %1936 }
 0xa06   : > { %v1450_v11 = vmul.f32 %v1937_v9, %v1442_v63 }
 0xa08   : > { %v1457_v13 = vmul.f32 %v1747_v10, %v1450_v11 }
 0xa0a   : > { %v1464_v14 = vadd.f32 %v1748_v12, %v1457_v13 }
 0xa0c   : > { %v1465_v15 = vpack.c.bf16 %v1464_v14, %v1464_v14 }
 0xa0e   : > { %1875 = vmatmul.mubr.msk.bf16.vlgmr.msra.gmra.mxu0 %vm518_vm1, %v1465_v15 }
 0xace   : > { %v1526_v21 = vpop.f32.mrf.mxu0 }
 0xacf   : > { %v1527_v22 = vadd.f32 %v1749_v20, %v1526_v21 }
 0xad0   : > { %v1876_v23 = vpop.f32.mrf.mxu0 }
 0xad1   : > { %v1533_v24 = vmul.f32 0.044715, %v1527_v22  ;;  %v1532_v31 = vmul.f32 0.5, %v1527_v22 }
 0xad2   : > { %v1529_v7 = vpop.f32.mrf.mxu0 }
 0xad3   : > { %v1534_v25 = vmul.f32 %v1533_v24, %v1527_v22 }
 0xad4   : > { %v1877_v26 = vpop.f32.mrf.mxu0 }
 0xad5   : > { %v1535_v27 = vmul.f32 %v1534_v25, %v1527_v22 }
 0xad7   : > { %v1536_v28 = vadd.f32 %v1535_v27, %v1527_v22 }
 0xad9   : > { %v1537_v29 = vmul.f32 0.7978846, %v1536_v28 }
 0xadb   : > { %1938 = vtanh.f32 %v1537_v29 }
 0xae8   : > { %v1939_v30 = vpop.eup %1938 }
 0xae9   : > { %v1539_v32 = vadd.f32 1.0, %v1939_v30 }
 0xaeb   : > { %v1540_v1 = vmul.f32 %v1539_v32, %v1532_v31 }
 0xaed   : > { %v1541_v33 = vpack.c.bf16 %v1540_v1, %v1540_v1 }
 0xaef   : > { %1887 = vmatmul.mubr.msk.bf16.vlgmr.msra.gmra.mxu1 %vm1581_vm7, %v1541_v33 }
 0xbaf   : > { %v1619_v35 = vpop.f32.mrf.mxu1 }
 0xbb0   : > { %v1620_v36 = vadd.f32 %v1753_v34, %v1619_v35 }
 0xbb1   : > { %v1888_v37 = vpop.f32.mrf.mxu1 }
 0xbb2   : > { %v1625_v38 = vadd.f32 %v1620_v36, %v1464_v14 }
 0xbb3   : > { %v1622_v39 = vpop.f32.mrf.mxu1 }
 0xbb4   : > { %v1628_v40 = vsel %vm518_vm1, %v1625_v38, 0.0 }
 0xbb5   : > { %1629 = vadd.xlane.f32.xlu0 %v1628_v40  ;;  %v1889_v41 = vpop.f32.mrf.mxu1 }
 0xc3e   : > { %v1630_v42 = vpop.xlane.xlu0 %1629 }
 0xc3f   : > { %v1631_v43 = vmul.f32 0.03125, %v1630_v42 }
 0xc41   : > { %v1632_v44 = vsub.f32 %v1625_v38, %v1631_v43 }
 0xc43   : > { %v1633_v45 = vmul.f32 %v1632_v44, %v1632_v44 }
 0xc45   : > { %v1634_v46 = vsel %vm518_vm1, %v1633_v45, 0.0 }
 0xc46   : > { %1635 = vadd.xlane.f32.xlu1 %v1634_v46 }
 0xccf   : > { %v1636_v47 = vpop.xlane.xlu1 %1635 }
 0xcd0   : > { %v1637_v48 = vmul.f32 0.03125, %v1636_v47 }
 0xcd2   : > { %v1638_v49 = vadd.f32 1e-12, %v1637_v48 }
 0xcd4   : > { %1940 = vrsqrt.f32 %v1638_v49 }
 0xce1   : > { %v1941_v50 = vpop.eup %1940 }
 0xce2   : > { %v1640_v52 = vmul.f32 %v1941_v50, %v1632_v44 }
 0xce4   : > { %v1647_v54 = vmul.f32 %v1759_v51, %v1640_v52 }
 0xce6   : > { %v1654_v55 = vadd.f32 %v1760_v53, %v1647_v54 }
 0xce8   : > { %1655 = vst.msk [vmem:[%s476_s23] sm:$0xff] %vm518_vm1, %v1654_v55 }
 0xce9 PF: > { %s24_s29 = sadd.s32 1, %s1948_s29  }
 0xcea   : > { %p21_p4 = scmp.ge.s32.totalorder %s24_s29, 4  }
 0xcec   :  { %23 = sbr.rel (!%p21_p4) target bundleno = 1 (0x1), region = 109 }

</bundles_post_ra>
